<compile_context>
chip_gen: v7x
topology: tpu7x:2x2x1
jax: 0.10.0
libtpu: 0.0.40
codegen_flags: <defaults>
</compile_context>

<pallas_src>
import math

import jax
import jax.numpy as jnp
from jax import lax
from jax.experimental import pallas as pl
from jax.experimental.pallas import tpu as pltpu

# ----------------------------------------------------------------------------
# Small config consistent with SAM's PromptEncoder structure
# ----------------------------------------------------------------------------
EMBED_DIM = 32                        # prompt embedding dim
MASK_IN_CHANS = 16                    # mask_downscaling hidden channels
IMAGE_EMBEDDING_SIZE = (16, 16)       # (H, W) of the dense embedding grid
INPUT_IMAGE_SIZE = (64, 64)           # (H, W) used to normalize prompt coords
MASK_INPUT_SIZE = (4 * IMAGE_EMBEDDING_SIZE[0], 4 * IMAGE_EMBEDDING_SIZE[1])
LN_EPS = 1e-6


# ----------------------------------------------------------------------------
# In-kernel math helpers (erf via Abramowitz & Stegun 7.1.26, |err| <= 1.5e-7,
# so GELU matches PyTorch's exact (erf-based) nn.GELU to f32 precision).
# The exp lands on the EUP slot; polynomial cost is negligible at these sizes.
# ----------------------------------------------------------------------------
def _erf(x):
    a1, a2, a3, a4, a5 = (0.254829592, -0.284496736, 1.421413741,
                          -1.453152027, 1.061405429)
    p = 0.3275911
    sgn = jnp.where(x >= 0.0, 1.0, -1.0)
    ax = jnp.abs(x)
    t = 1.0 / (1.0 + p * ax)
    poly = ((((a5 * t + a4) * t + a3) * t + a2) * t + a1) * t
    return sgn * (1.0 - poly * jnp.exp(-ax * ax))


def _gelu_exact(x):
    return x * 0.5 * (1.0 + _erf(x * (1.0 / math.sqrt(2.0))))


# ----------------------------------------------------------------------------
# The fused Pallas kernel
# ----------------------------------------------------------------------------
def prompt_encoder_kernel(coords_ref, labels_ref, inv_size_ref, gauss_ref,
                          table_ref, phases_ref, a1_ref, b1_ref, g1_ref,
                          be1_ref, avg1_ref, w2_ref, b2_ref, g2_ref, be2_ref,
                          avg2_ref, w3_ref, b3_ref, sparse_ref, dense_ref):
    """Fused SAM PromptEncoder forward.

    Sparse path:
      coords_ref : (BN, 2)  f32   raw pixel coords (points + box corners)
      labels_ref : (BN, 1)  i32   -1=pad, 0=neg pt, 1=pos pt, 2/3=box corners
      inv_size   : (1, 2)   f32   [1/W_img, 1/H_img]
      gauss_ref  : (2, D/2) f32   positional_encoding_gaussian_matrix
      table_ref  : (8, D)   f32   [not_a_point, pe0..pe3, 0, 0, 0]
      sparse_ref : (BN, D)  f32

    Dense path (channels on sublanes, spatial*batch on lanes, M = B*He*We):
      phases_ref : (16, M)  f32   row r*4+s = mask[b, 4i+r, 4j+s]
      a1_ref     : (16, 16) f32   conv1 (2x2/s2) as scatter matrix
      avg1_ref   : (16, 16) f32   channel-group averaging for LayerNorm2d #1
      w2_ref     : (16, 16) f32   conv2 (2x2/s2) weights, OIHW flattened
      avg2_ref   : (16, 16) f32   full-channel averaging for LayerNorm2d #2
      w3_ref     : (32, 16) f32   1x1 projection
      b*/g*/be*  : (C, 1)   f32   per-channel bias / LN scale / LN shift
      dense_ref  : (32, M)  f32
    """
    # ---- sparse (point + box) prompt embeddings -----------------------------
    c = (coords_ref[...] + 0.5) * inv_size_ref[...]          # normalize to [0,1]
    c = 2.0 * c - 1.0
    pe = jnp.dot(c, gauss_ref[...], preferred_element_type=jnp.float32)
    pe = 2.0 * jnp.pi * pe
    pe = jnp.concatenate([jnp.sin(pe), jnp.cos(pe)], axis=-1)  # (BN, D)

    labels = labels_ref[...]                                   # (BN, 1) i32
    keep = (labels != -1).astype(jnp.float32)                  # zero PE for pads
    pe = pe * keep

    nrows = table_ref.shape[0]
    bn = labels.shape[0]
    iota = jax.lax.broadcasted_iota(jnp.int32, (bn, nrows), 1)
    onehot = (iota == (labels + 1)).astype(jnp.float32)        # (BN, 8)
    off = jnp.dot(onehot, table_ref[...], preferred_element_type=jnp.float32)
    sparse_ref[...] = pe + off

    # ---- dense mask embedding: mask_downscaling ------------------------------
    p = phases_ref[...]                                        # (16, M)

    # conv1 (2x2, stride 2) + LayerNorm2d + GELU
    y = jnp.dot(a1_ref[...], p, preferred_element_type=jnp.float32) + b1_ref[...]
    m = jnp.dot(avg1_ref[...], y, preferred_element_type=jnp.float32)
    d = y - m
    v = jnp.dot(avg1_ref[...], d * d, preferred_element_type=jnp.float32)
    y = d * jax.lax.rsqrt(v + LN_EPS) * g1_ref[...] + be1_ref[...]
    y = _gelu_exact(y)

    # conv2 (2x2, stride 2) + LayerNorm2d + GELU
    y = jnp.dot(w2_ref[...], y, preferred_element_type=jnp.float32) + b2_ref[...]
    m = jnp.dot(avg2_ref[...], y, preferred_element_type=jnp.float32)
    d = y - m
    v = jnp.dot(avg2_ref[...], d * d, preferred_element_type=jnp.float32)
    y = d * jax.lax.rsqrt(v + LN_EPS) * g2_ref[...] + be2_ref[...]
    y = _gelu_exact(y)

    # final 1x1 conv (projection to embed_dim)
    dense_ref[...] = (jnp.dot(w3_ref[...], y, preferred_element_type=jnp.float32)
                      + b3_ref[...])


# ----------------------------------------------------------------------------
# pallas_call wrapper (gridless; whole arrays in VMEM — problem is tiny)
# ----------------------------------------------------------------------------
def _vmem_spec():
    return pl.BlockSpec(memory_space=pltpu.MemorySpace.VMEM)


def prompt_encoder_pallas(coords_flat, labels_flat, phases, params):
    bn = coords_flat.shape[0]
    m = phases.shape[1]
    d = EMBED_DIM
    inv_size = jnp.array([[1.0 / INPUT_IMAGE_SIZE[1], 1.0 / INPUT_IMAGE_SIZE[0]]],
                         jnp.float32)
    args = (coords_flat, labels_flat, inv_size, params["gauss"],
            params["table_pad"], phases, params["a1"], params["b1x"],
            params["g1x"], params["be1x"], params["avg1"], params["w2f"],
            params["b2x"], params["g2x"], params["be2x"], params["avg2"],
            params["w3f"], params["b3x"])
    return pl.pallas_call(
        prompt_encoder_kernel,
        out_shape=(jax.ShapeDtypeStruct((bn, d), jnp.float32),
                   jax.ShapeDtypeStruct((d, m), jnp.float32)),
        in_specs=[_vmem_spec() for _ in range(len(args))],
        out_specs=(_vmem_spec(), _vmem_spec()),
    )(*args)


# ----------------------------------------------------------------------------
# Glue: boundary layout plumbing only (NCHW <-> lane-dense kernel layout)
# ----------------------------------------------------------------------------
def prompt_encode_adapter_forward(params, points, boxes, masks):
    """Forward of BasePromptEncodeAdapter with points, boxes and masks given."""
    coords, labels = points                          # (B, Np, 2), (B, Np)
    b, n_pts, _ = coords.shape

    # sparse inputs: points + box corners (no pad point since boxes are given)
    box_corners = boxes.reshape(b, 2, 2)
    corner_labels = jnp.broadcast_to(jnp.array([2, 3], jnp.int32)[None, :], (b, 2))
    all_coords = jnp.concatenate([coords.astype(jnp.float32), box_corners], axis=1)
    all_labels = jnp.concatenate([labels.astype(jnp.int32), corner_labels], axis=1)
    n_tot = n_pts + 2
    coords_flat = all_coords.reshape(b * n_tot, 2)
    labels_flat = all_labels.reshape(b * n_tot, 1)

    # dense input: split the mask into 4x4 phase planes, spatial*batch on lanes
    bm, _, hm, wm = masks.shape
    he, we = hm // 4, wm // 4
    ph = masks.reshape(bm, he, 4, we, 4).transpose(2, 4, 0, 1, 3)  # (4,4,B,He,We)
    phases = ph.reshape(16, bm * he * we).astype(jnp.float32)      # (16, M)

    sparse, dense = prompt_encoder_pallas(coords_flat, labels_flat, phases, params)

    sparse_embeddings = sparse.reshape(b, n_tot, EMBED_DIM)
    dense_embeddings = dense.reshape(EMBED_DIM, bm, he, we).transpose(1, 0, 2, 3)
    return sparse_embeddings, dense_embeddings


# ----------------------------------------------------------------------------
# Deterministic parameter init (shapes per SAM PromptEncoder.__init__), plus
# the kernel-form (lane-dense) derived parameters.
# ----------------------------------------------------------------------------
def init_params(key):
    ks = jax.random.split(key, 16)
    c1 = MASK_IN_CHANS // 4        # 4
    c2 = MASK_IN_CHANS             # 16
    d = EMBED_DIM                  # 32

    gauss = jax.random.normal(ks[0], (2, d // 2), jnp.float32)      # scale=1.0
    point_table = jnp.stack(
        [jax.random.normal(ks[1 + i], (d,), jnp.float32) for i in range(5)], 0)
    no_mask = jax.random.normal(ks[6], (d,), jnp.float32)           # unused here

    w1_oihw = 0.5 * jax.random.normal(ks[7], (c1, 1, 2, 2), jnp.float32)
    b1 = 0.1 * jax.random.normal(ks[8], (c1,), jnp.float32)
    ln1_w = 1.0 + 0.1 * jax.random.normal(ks[9], (c1,), jnp.float32)
    ln1_b = 0.1 * jax.random.normal(ks[10], (c1,), jnp.float32)
    w2_oihw = 0.5 * jax.random.normal(ks[11], (c2, c1, 2, 2), jnp.float32)
    b2 = 0.1 * jax.random.normal(ks[12], (c2,), jnp.float32)
    ln2_w = 1.0 + 0.1 * jax.random.normal(ks[13], (c2,), jnp.float32)
    ln2_b = 0.1 * jax.random.normal(ks[14], (c2,), jnp.float32)
    w3_oihw = 0.5 * jax.random.normal(ks[15], (d, c2, 1, 1), jnp.float32)
    b3 = jnp.zeros((d,), jnp.float32)

    # --- kernel-form parameters ----------------------------------------------
    table_pad = jnp.concatenate([point_table, jnp.zeros((3, d), jnp.float32)], 0)

    # conv1 (2x2/s2) as a 16x16 scatter matrix acting on 4x4 mask phase planes:
    #   a1[co*4 + u*2 + v, (2u+kh)*4 + (2v+kw)] = w1[co, 0, kh, kw]
    a1 = jnp.zeros((4 * c1, 16), jnp.float32)
    for co in range(c1):
        for u in range(2):
            for v in range(2):
                for kh in range(2):
                    for kw in range(2):
                        a1 = a1.at[co * 4 + u * 2 + v,
                                   (2 * u + kh) * 4 + (2 * v + kw)
                                   ].set(w1_oihw[co, 0, kh, kw])

    # channel-group averaging matrices for the two LayerNorm2d layers
    idx = jnp.arange(4 * c1)
    avg1 = ((idx[:, None] % 4) == (idx[None, :] % 4)).astype(jnp.float32) / c1
    avg2 = jnp.full((c2, c2), 1.0 / c2, jnp.float32)

    return dict(
        gauss=gauss, point_table=point_table, table_pad=table_pad, no_mask=no_mask,
        a1=a1,
        b1x=jnp.repeat(b1, 4)[:, None],
        g1x=jnp.repeat(ln1_w, 4)[:, None],
        be1x=jnp.repeat(ln1_b, 4)[:, None],
        avg1=avg1, avg2=avg2,
        w2f=w2_oihw.reshape(c2, c1 * 4), b2x=b2[:, None],
        g2x=ln2_w[:, None], be2x=ln2_b[:, None],
        w3f=w3_oihw.reshape(d, c2), b3x=b3[:, None],
        # PyTorch-layout forms for the pure-JAX reference
        w1_oihw=w1_oihw, w2_oihw=w2_oihw, w3_oihw=w3_oihw,
        b1_v=b1, b2_v=b2, b3_v=b3,
        ln1_wv=ln1_w, ln1_bv=ln1_b, ln2_wv=ln2_w, ln2_bv=ln2_b,
    )


# ----------------------------------------------------------------------------
# Pure-JAX reference (mirrors torch SAM PromptEncoder semantics)
# ----------------------------------------------------------------------------
def _ref_layernorm2d(x, w, b):
    u = x.mean(axis=1, keepdims=True)
    s = ((x - u) ** 2).mean(axis=1, keepdims=True)
    x = (x - u) / jnp.sqrt(s + LN_EPS)
    return w[None, :, None, None] * x + b[None, :, None, None]


def _ref_pe(coords_norm, gauss):
    c = 2.0 * coords_norm - 1.0
    c = c @ gauss
    c = 2.0 * jnp.pi * c
    return jnp.concatenate([jnp.sin(c), jnp.cos(c)], axis=-1)


def reference_forward(params, points, boxes, masks):
    coords, labels = points
    b = coords.shape[0]
    h_img, w_img = INPUT_IMAGE_SIZE
    table = params["point_table"]
    # points (pad skipped because boxes is not None)
    pts = coords + 0.5
    pts_n = jnp.stack([pts[..., 0] / w_img, pts[..., 1] / h_img], axis=-1)
    pe_pts = _ref_pe(pts_n, params["gauss"])
    lab = labels[..., None]
    pe_pts = jnp.where(lab == -1, 0.0, pe_pts)
    pe_pts = pe_pts + jnp.where(lab == -1, table[0], 0.0)
    pe_pts = pe_pts + jnp.where(lab == 0, table[1], 0.0)
    pe_pts = pe_pts + jnp.where(lab == 1, table[2], 0.0)
    # boxes
    bc = boxes.reshape(b, 2, 2) + 0.5
    bc_n = jnp.stack([bc[..., 0] / w_img, bc[..., 1] / h_img], axis=-1)
    pe_box = _ref_pe(bc_n, params["gauss"])
    pe_box = pe_box.at[:, 0, :].add(table[3])
    pe_box = pe_box.at[:, 1, :].add(table[4])
    sparse = jnp.concatenate([pe_pts, pe_box], axis=1)
    # dense: mask_downscaling
    dn = ("NCHW", "OIHW", "NCHW")
    y = lax.conv_general_dilated(masks, params["w1_oihw"], (2, 2), "VALID",
                                 dimension_numbers=dn)
    y = y + params["b1_v"][None, :, None, None]
    y = jax.nn.gelu(_ref_layernorm2d(y, params["ln1_wv"], params["ln1_bv"]),
                    approximate=False)
    y = lax.conv_general_dilated(y, params["w2_oihw"], (2, 2), "VALID",
                                 dimension_numbers=dn)
    y = y + params["b2_v"][None, :, None, None]
    y = jax.nn.gelu(_ref_layernorm2d(y, params["ln2_wv"], params["ln2_bv"]),
                    approximate=False)
    y = lax.conv_general_dilated(y, params["w3_oihw"], (1, 1), "VALID",
                                 dimension_numbers=dn)
    y = y + params["b3_v"][None, :, None, None]
    return sparse, y


# ----------------------------------------------------------------------------
# Main
# ----------------------------------------------------------------------------
if __name__ == "__main__":
    key = jax.random.PRNGKey(0)
    kp, kc, kb, km = jax.random.split(key, 4)
    params = init_params(kp)

    B, NP = 2, 3
    point_coords = jax.random.uniform(kc, (B, NP, 2), jnp.float32,
                                      0.0, float(INPUT_IMAGE_SIZE[0]))
    point_labels = jnp.array([[1, 0, -1], [0, 1, 1]], jnp.int32)
    boxes = jax.random.uniform(kb, (B, 4), jnp.float32, 0.0,
                               float(INPUT_IMAGE_SIZE[0]))
    masks = jax.random.normal(km, (B, 1, MASK_INPUT_SIZE[0], MASK_INPUT_SIZE[1]),
                              jnp.float32)

    fwd = jax.jit(prompt_encode_adapter_forward)
    sparse, dense = fwd(params, (point_coords, point_labels), boxes, masks)
    jax.block_until_ready((sparse, dense))

    assert sparse.shape == (B, NP + 2, EMBED_DIM)
    assert dense.shape == (B, EMBED_DIM,
                           IMAGE_EMBEDDING_SIZE[0], IMAGE_EMBEDDING_SIZE[1])

    ref_sparse, ref_dense = reference_forward(
        params, (point_coords, point_labels), boxes, masks)
    assert jnp.allclose(sparse, ref_sparse, atol=3e-5, rtol=3e-5), "sparse mismatch"
    assert jnp.allclose(dense, ref_dense, atol=5e-4, rtol=5e-4), "dense mismatch"

    print("KERNEL_OK")
</pallas_src>

<mosaic_0001>
module attributes {stable_mosaic.version = 11 : i64} {
  func.func @prompt_encoder_kernel(%arg0: memref<10x2xf32, #tpu.memory_space<vmem>>, %arg1: memref<10x1xi32, #tpu.memory_space<vmem>>, %arg2: memref<1x2xf32, #tpu.memory_space<vmem>>, %arg3: memref<2x16xf32, #tpu.memory_space<vmem>>, %arg4: memref<8x32xf32, #tpu.memory_space<vmem>>, %arg5: memref<16x512xf32, #tpu.memory_space<vmem>>, %arg6: memref<16x16xf32, #tpu.memory_space<vmem>>, %arg7: memref<16x1xf32, #tpu.memory_space<vmem>>, %arg8: memref<16x1xf32, #tpu.memory_space<vmem>>, %arg9: memref<16x1xf32, #tpu.memory_space<vmem>>, %arg10: memref<16x16xf32, #tpu.memory_space<vmem>>, %arg11: memref<16x16xf32, #tpu.memory_space<vmem>>, %arg12: memref<16x1xf32, #tpu.memory_space<vmem>>, %arg13: memref<16x1xf32, #tpu.memory_space<vmem>>, %arg14: memref<16x1xf32, #tpu.memory_space<vmem>>, %arg15: memref<16x16xf32, #tpu.memory_space<vmem>>, %arg16: memref<32x16xf32, #tpu.memory_space<vmem>>, %arg17: memref<32x1xf32, #tpu.memory_space<vmem>>, %arg18: memref<10x32xf32, #tpu.memory_space<vmem>>, %arg19: memref<32x512xf32, #tpu.memory_space<vmem>>) attributes {dimension_semantics = [], scalar_prefetch = 0 : i64, scratch_operands = 0 : i64, tpu.core_type = #tpu.core_type<tc>} {
    %c0 = arith.constant 0 : index
    %c0_0 = arith.constant 0 : index
    %0 = vector.load %arg0[%c0, %c0_0] : memref<10x2xf32, #tpu.memory_space<vmem>>, vector<10x2xf32>
    %cst = arith.constant 5.000000e-01 : f32
    %1 = vector.broadcast %cst : f32 to vector<10x2xf32>
    %2 = arith.addf %0, %1 : vector<10x2xf32>
    %c0_1 = arith.constant 0 : index
    %c0_2 = arith.constant 0 : index
    %3 = vector.load %arg2[%c0_1, %c0_2] : memref<1x2xf32, #tpu.memory_space<vmem>>, vector<1x2xf32>
    %4 = vector.broadcast %3 : vector<1x2xf32> to vector<10x2xf32>
    %5 = arith.mulf %2, %4 : vector<10x2xf32>
    %cst_3 = arith.constant 2.000000e+00 : f32
    %6 = vector.broadcast %cst_3 : f32 to vector<10x2xf32>
    %7 = arith.mulf %6, %5 : vector<10x2xf32>
    %cst_4 = arith.constant 1.000000e+00 : f32
    %8 = vector.broadcast %cst_4 : f32 to vector<10x2xf32>
    %9 = arith.subf %7, %8 : vector<10x2xf32>
    %c0_5 = arith.constant 0 : index
    %c0_6 = arith.constant 0 : index
    %10 = vector.load %arg3[%c0_5, %c0_6] : memref<2x16xf32, #tpu.memory_space<vmem>>, vector<2x16xf32>
    %cst_7 = arith.constant dense<0.000000e+00> : vector<10x16xf32>
    %11 = tpu.matmul %9, %10, %cst_7 {dimension_numbers = #tpu.dot_dimension_numbers<[1], [0], [0], [1], [0, 0, 1, 1], [], []>} : vector<10x2xf32>, vector<2x16xf32>, vector<10x16xf32> -> vector<10x16xf32>
    %cst_8 = arith.constant 6.28318548 : f32
    %12 = vector.broadcast %cst_8 : f32 to vector<10x16xf32>
    %13 = arith.mulf %12, %11 : vector<10x16xf32>
    %14 = math.sin %13 : vector<10x16xf32>
    %15 = math.cos %13 : vector<10x16xf32>
    %16 = tpu.concatenate %14, %15 in 1 : vector<10x16xf32>, vector<10x16xf32> -> vector<10x32xf32>
    %c0_9 = arith.constant 0 : index
    %c0_10 = arith.constant 0 : index
    %17 = vector.load %arg1[%c0_9, %c0_10] : memref<10x1xi32, #tpu.memory_space<vmem>>, vector<10x1xi32>
    %c-1_i32 = arith.constant -1 : i32
    %18 = vector.broadcast %c-1_i32 : i32 to vector<10x1xi32>
    %19 = arith.cmpi ne, %17, %18 : vector<10x1xi32>
    %20 = arith.extui %19 : vector<10x1xi1> to vector<10x1xi32>
    %21 = arith.sitofp %20 : vector<10x1xi32> to vector<10x1xf32>
    %22 = vector.broadcast %21 : vector<10x1xf32> to vector<10x32xf32>
    %23 = arith.mulf %16, %22 : vector<10x32xf32>
    %24 = tpu.iota {dimensions = array<i32: 1>} : vector<10x8xi32>
    %c1_i32 = arith.constant 1 : i32
    %25 = vector.broadcast %c1_i32 : i32 to vector<10x1xi32>
    %26 = arith.addi %17, %25 : vector<10x1xi32>
    %27 = vector.broadcast %26 : vector<10x1xi32> to vector<10x8xi32>
    %28 = arith.cmpi eq, %24, %27 : vector<10x8xi32>
    %29 = arith.extui %28 : vector<10x8xi1> to vector<10x8xi32>
    %30 = arith.sitofp %29 : vector<10x8xi32> to vector<10x8xf32>
    %c0_11 = arith.constant 0 : index
    %c0_12 = arith.constant 0 : index
    %31 = vector.load %arg4[%c0_11, %c0_12] : memref<8x32xf32, #tpu.memory_space<vmem>>, vector<8x32xf32>
    %cst_13 = arith.constant dense<0.000000e+00> : vector<10x32xf32>
    %32 = tpu.matmul %30, %31, %cst_13 {dimension_numbers = #tpu.dot_dimension_numbers<[1], [0], [0], [1], [0, 0, 1, 1], [], []>} : vector<10x8xf32>, vector<8x32xf32>, vector<10x32xf32> -> vector<10x32xf32>
    %33 = arith.addf %23, %32 : vector<10x32xf32>
    %c0_14 = arith.constant 0 : index
    %c0_15 = arith.constant 0 : index
    %34 = vector.load %arg18[%c0_14, %c0_15] : memref<10x32xf32, #tpu.memory_space<vmem>>, vector<10x32xf32>
    tpu.vector_store %arg18[%c0_14, %c0_15], %33 {strides = array<i32>} : memref<10x32xf32, #tpu.memory_space<vmem>>, vector<10x32xf32>,
    %c0_16 = arith.constant 0 : index
    %c0_17 = arith.constant 0 : index
    %35 = vector.load %arg5[%c0_16, %c0_17] : memref<16x512xf32, #tpu.memory_space<vmem>>, vector<16x512xf32>
    %c0_18 = arith.constant 0 : index
    %c0_19 = arith.constant 0 : index
    %36 = vector.load %arg6[%c0_18, %c0_19] : memref<16x16xf32, #tpu.memory_space<vmem>>, vector<16x16xf32>
    %cst_20 = arith.constant dense<0.000000e+00> : vector<16x512xf32>
    %37 = tpu.matmul %36, %35, %cst_20 {dimension_numbers = #tpu.dot_dimension_numbers<[1], [0], [0], [1], [0, 0, 1, 1], [], []>} : vector<16x16xf32>, vector<16x512xf32>, vector<16x512xf32> -> vector<16x512xf32>
    %c0_21 = arith.constant 0 : index
    %c0_22 = arith.constant 0 : index
    %38 = vector.load %arg7[%c0_21, %c0_22] : memref<16x1xf32, #tpu.memory_space<vmem>>, vector<16x1xf32>
    %39 = vector.broadcast %38 : vector<16x1xf32> to vector<16x512xf32>
    %40 = arith.addf %37, %39 : vector<16x512xf32>
    %c0_23 = arith.constant 0 : index
    %c0_24 = arith.constant 0 : index
    %41 = vector.load %arg10[%c0_23, %c0_24] : memref<16x16xf32, #tpu.memory_space<vmem>>, vector<16x16xf32>
    %cst_25 = arith.constant dense<0.000000e+00> : vector<16x512xf32>
    %42 = tpu.matmul %41, %40, %cst_25 {dimension_numbers = #tpu.dot_dimension_numbers<[1], [0], [0], [1], [0, 0, 1, 1], [], []>} : vector<16x16xf32>, vector<16x512xf32>, vector<16x512xf32> -> vector<16x512xf32>
    %43 = arith.subf %40, %42 : vector<16x512xf32>
    %c0_26 = arith.constant 0 : index
    %c0_27 = arith.constant 0 : index
    %44 = vector.load %arg10[%c0_26, %c0_27] : memref<16x16xf32, #tpu.memory_space<vmem>>, vector<16x16xf32>
    %45 = arith.mulf %43, %43 : vector<16x512xf32>
    %cst_28 = arith.constant dense<0.000000e+00> : vector<16x512xf32>
    %46 = tpu.matmul %44, %45, %cst_28 {dimension_numbers = #tpu.dot_dimension_numbers<[1], [0], [0], [1], [0, 0, 1, 1], [], []>} : vector<16x16xf32>, vector<16x512xf32>, vector<16x512xf32> -> vector<16x512xf32>
    %cst_29 = arith.constant 9.99999997E-7 : f32
    %47 = vector.broadcast %cst_29 : f32 to vector<16x512xf32>
    %48 = arith.addf %46, %47 : vector<16x512xf32>
    %49 = math.rsqrt %48 : vector<16x512xf32>
    %50 = arith.mulf %43, %49 : vector<16x512xf32>
    %c0_30 = arith.constant 0 : index
    %c0_31 = arith.constant 0 : index
    %51 = vector.load %arg8[%c0_30, %c0_31] : memref<16x1xf32, #tpu.memory_space<vmem>>, vector<16x1xf32>
    %52 = vector.broadcast %51 : vector<16x1xf32> to vector<16x512xf32>
    %53 = arith.mulf %50, %52 : vector<16x512xf32>
    %c0_32 = arith.constant 0 : index
    %c0_33 = arith.constant 0 : index
    %54 = vector.load %arg9[%c0_32, %c0_33] : memref<16x1xf32, #tpu.memory_space<vmem>>, vector<16x1xf32>
    %55 = vector.broadcast %54 : vector<16x1xf32> to vector<16x512xf32>
    %56 = arith.addf %53, %55 : vector<16x512xf32>
    %cst_34 = arith.constant 5.000000e-01 : f32
    %57 = vector.broadcast %cst_34 : f32 to vector<16x512xf32>
    %58 = arith.mulf %56, %57 : vector<16x512xf32>
    %cst_35 = arith.constant 0.707106769 : f32
    %59 = vector.broadcast %cst_35 : f32 to vector<16x512xf32>
    %60 = arith.mulf %56, %59 : vector<16x512xf32>
    %cst_36 = arith.constant 0.000000e+00 : f32
    %61 = vector.broadcast %cst_36 : f32 to vector<16x512xf32>
    %62 = arith.cmpf oge, %60, %61 : vector<16x512xf32>
    %cst_37 = arith.constant 1.000000e+00 : f32
    %cst_38 = arith.constant -1.000000e+00 : f32
    %63 = vector.broadcast %cst_37 : f32 to vector<16x512xf32>
    %64 = vector.broadcast %cst_38 : f32 to vector<16x512xf32>
    %65 = arith.select %62, %63, %64 : vector<16x512xi1>, vector<16x512xf32>
    %66 = math.absf %60 : vector<16x512xf32>
    %cst_39 = arith.constant 0.327591091 : f32
    %67 = vector.broadcast %cst_39 : f32 to vector<16x512xf32>
    %68 = arith.mulf %67, %66 : vector<16x512xf32>
    %cst_40 = arith.constant 1.000000e+00 : f32
    %69 = vector.broadcast %cst_40 : f32 to vector<16x512xf32>
    %70 = arith.addf %69, %68 : vector<16x512xf32>
    %cst_41 = arith.constant 1.000000e+00 : f32
    %71 = vector.broadcast %cst_41 : f32 to vector<16x512xf32>
    %72 = arith.divf %71, %70 : vector<16x512xf32>
    %cst_42 = arith.constant 1.06140542 : f32
    %73 = vector.broadcast %cst_42 : f32 to vector<16x512xf32>
    %74 = arith.mulf %73, %72 : vector<16x512xf32>
    %cst_43 = arith.constant -1.45315206 : f32
    %75 = vector.broadcast %cst_43 : f32 to vector<16x512xf32>
    %76 = arith.addf %74, %75 : vector<16x512xf32>
    %77 = arith.mulf %76, %72 : vector<16x512xf32>
    %cst_44 = arith.constant 1.42141378 : f32
    %78 = vector.broadcast %cst_44 : f32 to vector<16x512xf32>
    %79 = arith.addf %77, %78 : vector<16x512xf32>
    %80 = arith.mulf %79, %72 : vector<16x512xf32>
    %cst_45 = arith.constant -0.284496725 : f32
    %81 = vector.broadcast %cst_45 : f32 to vector<16x512xf32>
    %82 = arith.addf %80, %81 : vector<16x512xf32>
    %83 = arith.mulf %82, %72 : vector<16x512xf32>
    %cst_46 = arith.constant 0.254829586 : f32
    %84 = vector.broadcast %cst_46 : f32 to vector<16x512xf32>
    %85 = arith.addf %83, %84 : vector<16x512xf32>
    %86 = arith.mulf %85, %72 : vector<16x512xf32>
    %cst_47 = arith.constant 0.000000e+00 : f32
    %87 = vector.broadcast %cst_47 : f32 to vector<16x512xf32>
    %88 = arith.subf %87, %66 : vector<16x512xf32>
    %89 = arith.mulf %88, %66 : vector<16x512xf32>
    %90 = math.exp %89 : vector<16x512xf32>
    %91 = arith.mulf %86, %90 : vector<16x512xf32>
    %cst_48 = arith.constant 1.000000e+00 : f32
    %92 = vector.broadcast %cst_48 : f32 to vector<16x512xf32>
    %93 = arith.subf %92, %91 : vector<16x512xf32>
    %94 = arith.mulf %65, %93 : vector<16x512xf32>
    %cst_49 = arith.constant 1.000000e+00 : f32
    %95 = vector.broadcast %cst_49 : f32 to vector<16x512xf32>
    %96 = arith.addf %95, %94 : vector<16x512xf32>
    %97 = arith.mulf %58, %96 : vector<16x512xf32>
    %c0_50 = arith.constant 0 : index
    %c0_51 = arith.constant 0 : index
    %98 = vector.load %arg11[%c0_50, %c0_51] : memref<16x16xf32, #tpu.memory_space<vmem>>, vector<16x16xf32>
    %cst_52 = arith.constant dense<0.000000e+00> : vector<16x512xf32>
    %99 = tpu.matmul %98, %97, %cst_52 {dimension_numbers = #tpu.dot_dimension_numbers<[1], [0], [0], [1], [0, 0, 1, 1], [], []>} : vector<16x16xf32>, vector<16x512xf32>, vector<16x512xf32> -> vector<16x512xf32>
    %c0_53 = arith.constant 0 : index
    %c0_54 = arith.constant 0 : index
    %100 = vector.load %arg12[%c0_53, %c0_54] : memref<16x1xf32, #tpu.memory_space<vmem>>, vector<16x1xf32>
    %101 = vector.broadcast %100 : vector<16x1xf32> to vector<16x512xf32>
    %102 = arith.addf %99, %101 : vector<16x512xf32>
    %c0_55 = arith.constant 0 : index
    %c0_56 = arith.constant 0 : index
    %103 = vector.load %arg15[%c0_55, %c0_56] : memref<16x16xf32, #tpu.memory_space<vmem>>, vector<16x16xf32>
    %cst_57 = arith.constant dense<0.000000e+00> : vector<16x512xf32>
    %104 = tpu.matmul %103, %102, %cst_57 {dimension_numbers = #tpu.dot_dimension_numbers<[1], [0], [0], [1], [0, 0, 1, 1], [], []>} : vector<16x16xf32>, vector<16x512xf32>, vector<16x512xf32> -> vector<16x512xf32>
    %105 = arith.subf %102, %104 : vector<16x512xf32>
    %c0_58 = arith.constant 0 : index
    %c0_59 = arith.constant 0 : index
    %106 = vector.load %arg15[%c0_58, %c0_59] : memref<16x16xf32, #tpu.memory_space<vmem>>, vector<16x16xf32>
    %107 = arith.mulf %105, %105 : vector<16x512xf32>
    %cst_60 = arith.constant dense<0.000000e+00> : vector<16x512xf32>
    %108 = tpu.matmul %106, %107, %cst_60 {dimension_numbers = #tpu.dot_dimension_numbers<[1], [0], [0], [1], [0, 0, 1, 1], [], []>} : vector<16x16xf32>, vector<16x512xf32>, vector<16x512xf32> -> vector<16x512xf32>
    %cst_61 = arith.constant 9.99999997E-7 : f32
    %109 = vector.broadcast %cst_61 : f32 to vector<16x512xf32>
    %110 = arith.addf %108, %109 : vector<16x512xf32>
    %111 = math.rsqrt %110 : vector<16x512xf32>
    %112 = arith.mulf %105, %111 : vector<16x512xf32>
    %c0_62 = arith.constant 0 : index
    %c0_63 = arith.constant 0 : index
    %113 = vector.load %arg13[%c0_62, %c0_63] : memref<16x1xf32, #tpu.memory_space<vmem>>, vector<16x1xf32>
    %114 = vector.broadcast %113 : vector<16x1xf32> to vector<16x512xf32>
    %115 = arith.mulf %112, %114 : vector<16x512xf32>
    %c0_64 = arith.constant 0 : index
    %c0_65 = arith.constant 0 : index
    %116 = vector.load %arg14[%c0_64, %c0_65] : memref<16x1xf32, #tpu.memory_space<vmem>>, vector<16x1xf32>
    %117 = vector.broadcast %116 : vector<16x1xf32> to vector<16x512xf32>
    %118 = arith.addf %115, %117 : vector<16x512xf32>
    %cst_66 = arith.constant 5.000000e-01 : f32
    %119 = vector.broadcast %cst_66 : f32 to vector<16x512xf32>
    %120 = arith.mulf %118, %119 : vector<16x512xf32>
    %cst_67 = arith.constant 0.707106769 : f32
    %121 = vector.broadcast %cst_67 : f32 to vector<16x512xf32>
    %122 = arith.mulf %118, %121 : vector<16x512xf32>
    %cst_68 = arith.constant 0.000000e+00 : f32
    %123 = vector.broadcast %cst_68 : f32 to vector<16x512xf32>
    %124 = arith.cmpf oge, %122, %123 : vector<16x512xf32>
    %cst_69 = arith.constant 1.000000e+00 : f32
    %cst_70 = arith.constant -1.000000e+00 : f32
    %125 = vector.broadcast %cst_69 : f32 to vector<16x512xf32>
    %126 = vector.broadcast %cst_70 : f32 to vector<16x512xf32>
    %127 = arith.select %124, %125, %126 : vector<16x512xi1>, vector<16x512xf32>
    %128 = math.absf %122 : vector<16x512xf32>
    %cst_71 = arith.constant 0.327591091 : f32
    %129 = vector.broadcast %cst_71 : f32 to vector<16x512xf32>
    %130 = arith.mulf %129, %128 : vector<16x512xf32>
    %cst_72 = arith.constant 1.000000e+00 : f32
    %131 = vector.broadcast %cst_72 : f32 to vector<16x512xf32>
    %132 = arith.addf %131, %130 : vector<16x512xf32>
    %cst_73 = arith.constant 1.000000e+00 : f32
    %133 = vector.broadcast %cst_73 : f32 to vector<16x512xf32>
    %134 = arith.divf %133, %132 : vector<16x512xf32>
    %cst_74 = arith.constant 1.06140542 : f32
    %135 = vector.broadcast %cst_74 : f32 to vector<16x512xf32>
    %136 = arith.mulf %135, %134 : vector<16x512xf32>
    %cst_75 = arith.constant -1.45315206 : f32
    %137 = vector.broadcast %cst_75 : f32 to vector<16x512xf32>
    %138 = arith.addf %136, %137 : vector<16x512xf32>
    %139 = arith.mulf %138, %134 : vector<16x512xf32>
    %cst_76 = arith.constant 1.42141378 : f32
    %140 = vector.broadcast %cst_76 : f32 to vector<16x512xf32>
    %141 = arith.addf %139, %140 : vector<16x512xf32>
    %142 = arith.mulf %141, %134 : vector<16x512xf32>
    %cst_77 = arith.constant -0.284496725 : f32
    %143 = vector.broadcast %cst_77 : f32 to vector<16x512xf32>
    %144 = arith.addf %142, %143 : vector<16x512xf32>
    %145 = arith.mulf %144, %134 : vector<16x512xf32>
    %cst_78 = arith.constant 0.254829586 : f32
    %146 = vector.broadcast %cst_78 : f32 to vector<16x512xf32>
    %147 = arith.addf %145, %146 : vector<16x512xf32>
    %148 = arith.mulf %147, %134 : vector<16x512xf32>
    %cst_79 = arith.constant 0.000000e+00 : f32
    %149 = vector.broadcast %cst_79 : f32 to vector<16x512xf32>
    %150 = arith.subf %149, %128 : vector<16x512xf32>
    %151 = arith.mulf %150, %128 : vector<16x512xf32>
    %152 = math.exp %151 : vector<16x512xf32>
    %153 = arith.mulf %148, %152 : vector<16x512xf32>
    %cst_80 = arith.constant 1.000000e+00 : f32
    %154 = vector.broadcast %cst_80 : f32 to vector<16x512xf32>
    %155 = arith.subf %154, %153 : vector<16x512xf32>
    %156 = arith.mulf %127, %155 : vector<16x512xf32>
    %cst_81 = arith.constant 1.000000e+00 : f32
    %157 = vector.broadcast %cst_81 : f32 to vector<16x512xf32>
    %158 = arith.addf %157, %156 : vector<16x512xf32>
    %159 = arith.mulf %120, %158 : vector<16x512xf32>
    %c0_82 = arith.constant 0 : index
    %c0_83 = arith.constant 0 : index
    %160 = vector.load %arg16[%c0_82, %c0_83] : memref<32x16xf32, #tpu.memory_space<vmem>>, vector<32x16xf32>
    %cst_84 = arith.constant dense<0.000000e+00> : vector<32x512xf32>
    %161 = tpu.matmul %160, %159, %cst_84 {dimension_numbers = #tpu.dot_dimension_numbers<[1], [0], [0], [1], [0, 0, 1, 1], [], []>} : vector<32x16xf32>, vector<16x512xf32>, vector<32x512xf32> -> vector<32x512xf32>
    %c0_85 = arith.constant 0 : index
    %c0_86 = arith.constant 0 : index
    %162 = vector.load %arg17[%c0_85, %c0_86] : memref<32x1xf32, #tpu.memory_space<vmem>>, vector<32x1xf32>
    %163 = vector.broadcast %162 : vector<32x1xf32> to vector<32x512xf32>
    %164 = arith.addf %161, %163 : vector<32x512xf32>
    %c0_87 = arith.constant 0 : index
    %c0_88 = arith.constant 0 : index
    %165 = vector.load %arg19[%c0_87, %c0_88] : memref<32x512xf32, #tpu.memory_space<vmem>>, vector<32x512xf32>
    tpu.vector_store %arg19[%c0_87, %c0_88], %164 {strides = array<i32>} : memref<32x512xf32, #tpu.memory_space<vmem>>, vector<32x512xf32>,
    return
  }
}

</mosaic_0001>

<bundles_post_ra>
// kernel: prompt_encode_adapter_forward.1
= control target key start
LH: loop header
LB: loop body
LE: loop exit
PB: predicated region body
PF: predicated region fallthrough
CT: control target
= control target key end

     0   :  { %vm86_vm0 = vcmask 1041408   ;;  %v2784_v0 = vmov 0   ;;  %vm79_vm1 = vcmask 15360   ;;  %v2785_v30 = vmov 0.0   ;;  %s3586_s1 = inlined_call_operand.vmem [shape: s32[10,1], index: 1, kind: input, shape index: {}]   ;;  %s3587_s3 = inlined_call_operand.vmem [shape: f32[2,16], index: 3, kind: input, shape index: {}]   ;;  %s3588_s0 = inlined_call_operand.vmem [shape: f32[10,2], index: 0, kind: input, shape index: {}]   ;;  %s3589_s2 = inlined_call_operand.vmem [shape: f32[1,2], index: 2, kind: input, shape index: {}]   ;;  %s3590_s5 = inlined_call_operand.vmem [shape: f32[16,512], index: 5, kind: input, shape index: {}]   ;;  %s3591_s7 = inlined_call_operand.vmem [shape: f32[16,1], index: 7, kind: input, shape index: {}]   ;;  %s3592_s8 = inlined_call_operand.vmem [shape: f32[16,1], index: 8, kind: input, shape index: {}]   ;;  %s3593_s4 = inlined_call_operand.vmem [shape: f32[8,32], index: 4, kind: input, shape index: {}]   ;;  %s3594_s6 = inlined_call_operand.vmem [shape: f32[16,16], index: 6, kind: input, shape index: {}]   ;;  %s3595_s9 = inlined_call_operand.vmem [shape: f32[16,1], index: 9, kind: input, shape index: {}]   ;;  %s3596_s12 = inlined_call_operand.vmem [shape: f32[16,1], index: 12, kind: input, shape index: {}]   ;;  %s3597_s13 = inlined_call_operand.vmem [shape: f32[16,1], index: 13, kind: input, shape index: {}]   ;;  %s3598_s14 = inlined_call_operand.vmem [shape: f32[16,1], index: 14, kind: input, shape index: {}]   ;;  %s3599_s17 = inlined_call_operand.vmem [shape: f32[32,1], index: 17, kind: input, shape index: {}]   ;;  %s3600_s10 = inlined_call_operand.vmem [shape: f32[16,16], index: 10, kind: input, shape index: {}]   ;;  %s3601_s18 = inlined_call_operand.vmem [shape: f32[10,32], index: 18, kind: output, shape index: {0}]   ;;  %s3602_s11 = inlined_call_operand.vmem [shape: f32[16,16], index: 11, kind: input, shape index: {}]   ;;  %s3603_s15 = inlined_call_operand.vmem [shape: f32[16,16], index: 15, kind: input, shape index: {}]   ;;  %s3604_s16 = inlined_call_operand.vmem [shape: f32[32,16], index: 16, kind: input, shape index: {}]   ;;  %s3605_s19 = inlined_call_operand.vmem [shape: f32[32,512], index: 19, kind: output, shape index: {1}]  }
   0x1   :  { %3608 = sst [smem:[#allocation2_spill]] %s3586_s1  ;;  %2673 = vset.pattern.permute.xlu0 %v2784_v0  ;;  %2674 = vset.pattern.permute.xlu1 %v2784_v0  ;;  %v718_v6 = vld [vmem:[%s3590_s5 + $0x8] sm:$0xff]  ;;  %v717_v16 = vld [vmem:[%s3590_s5] sm:$0xff]  ;;  %v720_v25 = vld [vmem:[%s3590_s5 + $0x18] sm:$0xff]  ;;  %vm589_vm2 = vcmask 130048   ;;  %v612_v49 = vlaneseq  ;;  %vm629_vm5 = vcmask 64512  }
   0x2   :  { %3609 = sst [smem:[#allocation3_spill]] %s3587_s3  ;;  %s3612_s20 = sld [smem:[#allocation2_spill]]  ;;  %v722_v12 = vld [vmem:[%s3590_s5 + $0x28] sm:$0xff]  ;;  %v721_v17 = vld [vmem:[%s3590_s5 + $0x20] sm:$0xff]  ;;  %v724_v26 = vld [vmem:[%s3590_s5 + $0x38] sm:$0xff] }
   0x3   :  { %3610 = sst [smem:[#allocation4_spill]] %s3588_s0  ;;  %s3613_s23 = sld [smem:[#allocation3_spill]]  ;;  %v2599_v14 = vpack.c.bf16 %v722_v12, %v718_v6  ;;  %v727_v20 = vld [vmem:[%s3591_s7] sm:$0xff]  ;;  %v2601_v24 = vpack.c.bf16 %v721_v17, %v717_v16  ;;  %v2603_v28 = vpack.c.bf16 %v724_v26, %v720_v25  ;;  %v728_v29 = vld [vmem:[%s3591_s7 + $0x8] sm:$0xff]  ;;  %v2288_v41 = vld [vmem:[%s3599_s17 + $0x18] sm:$0xff]  ;;  %v613_v50 = vand.u32 127, %v612_v49 }
   0x4   :  { %3611 = sst [smem:[#allocation5_spill]] %s3589_s2  ;;  %s3614_s2 = sld [smem:[#allocation4_spill]]  ;;  %v628_v21 = vld [vmem:[%s3593_s4] sm:$0xff]  ;;  %731 = vperm.xlu1 %2674, %v727_v20   ;;  %v726_v33 = vld [vmem:[%s3594_s6 + $0x8] sm:$0xff]  ;;  %v2287_v48 = vld [vmem:[%s3599_s17 + $0x10] sm:$0xff] }
   0x5   :  { %v1247_v23 = vld [vmem:[%s3592_s8] sm:$0xff]  ;;  %2594 = vmatprep.subr.mxu1 %v628_v21  ;;  %v2286_v40 = vld [vmem:[%s3599_s17 + $0x8] sm:$0xff]  ;;  %v719_v52 = vld [vmem:[%s3590_s5 + $0x10] sm:$0xff] }
   0x6   :  { %2595 = vmatpush3.msra.mxu1 %v628_v21  ;;  %v725_v31 = vld [vmem:[%s3594_s6] sm:$0xff]  ;;  %v1248_v42 = vld [vmem:[%s3592_s8 + $0x8] sm:$0xff]  ;;  %v723_v53 = vld [vmem:[%s3590_s5 + $0x30] sm:$0xff] }
   0x7   :  { %v1267_v32 = vld [vmem:[%s3595_s9] sm:$0xff]  ;;  %2604 = vmatprep.subr.bf16.mxu1 %v2603_v28  ;;  %v1268_v43 = vld [vmem:[%s3595_s9 + $0x8] sm:$0xff]  ;;  %v2605_v56 = vpack.c.bf16 %v723_v53, %v719_v52 }
   0x8   :  { %v2897_v1 = vld [vmem:[%s3612_s20] sm:$0xff]  ;;  %v2902_v2 = vld [vmem:[%s3612_s20 + $0x8] sm:$0x3]  ;;  %s3615_s20 = sld [smem:[#allocation5_spill]]  ;;  %736 = vperm.xlu1 %2674, %v728_v29  }
   0x9   :  { %v78_v3 = vld [vmem:[%s3613_s23] sm:$0x3]  ;;  %v614_v4 = vadd.s32 1, %v2897_v1  ;;  %v615_v10 = vadd.s32 1, %v2902_v2  ;;  %vm595_vm3 = vcmp.ne.s32.totalorder %v2902_v2, 4294967295  ;;  %vm594_vm4 = vcmp.ne.s32.totalorder %v2897_v1, 4294967295 }
   0xa   :  { %2589 = vmatprep.subr.msk.mxu0 %vm86_vm0, %v78_v3  ;;  %v61_v5 = vld [vmem:[%s3614_s2] sm:$0xff]  ;;  %v62_v7 = vld [vmem:[%s3614_s2 + $0x8] sm:$0x3]  ;;  %v2545_v36 = vsel %vm594_vm4, 1.0, %v2785_v30  ;;  %v2546_v38 = vsel %vm595_vm3, 1.0, %v2785_v30 }
   0xb   :  { %2590 = vmatpush3.msk.msra.mxu0 %vm86_vm0, %v78_v3  ;;  %v63_v8 = vadd.f32 0.5, %v61_v5  ;;  %617 = vperm.xlu0 %2673, %v614_v4   ;;  %v64_v11 = vadd.f32 0.5, %v62_v7  ;;  %v1505_v34 = vld [vmem:[%s3596_s12] sm:$0xff]  ;;  %v2675_v39 = vpack.i.bf16 %v2546_v38, %v2545_v36  ;;  %v1506_v44 = vld [vmem:[%s3596_s12 + $0x8] sm:$0xff] }
   0xc   :  { %2600 = vmatprep.subr.bf16.mxu0 %v2599_v14  ;;  %v2025_v35 = vld [vmem:[%s3597_s13] sm:$0xff]  ;;  %1256 = vperm.xlu1 %2674, %v1248_v42   ;;  %v2026_v45 = vld [vmem:[%s3597_s13 + $0x8] sm:$0xff]  ;;  %v2790_v42 = vmov 920167782  }
   0xd   :  { %v2045_v37 = vld [vmem:[%s3598_s14] sm:$0xff]  ;;  %v2046_v46 = vld [vmem:[%s3598_s14 + $0x8] sm:$0xff] }
   0xe   :  { %v2523_v9 = vld [vmem:[%s3615_s20] ss:$0 sm:$0xff] }
   0xf   :  { %v72_v13 = vmul.f32 %v2523_v9, %v63_v8  ;;  %v73_v15 = vmul.f32 %v2523_v9, %v64_v11  ;;  %620 = vperm.xlu0 %2673, %v615_v10   ;;  %v2285_v47 = vld [vmem:[%s3599_s17] sm:$0xff] }
  0x10   :  { %1276 = vperm.xlu1 %2674, %v1268_v43  }
  0x11   :  { %v74_v18 = vmul.f32 2.0, %v72_v13  ;;  %v75_v19 = vmul.f32 2.0, %v73_v15 }
  0x13   :  { %v2524_v22 = vadd.f32 -1.0, %v74_v18  ;;  %v2525_v27 = vadd.f32 -1.0, %v75_v19  ;;  %1251 = vperm.xlu0 %2673, %v1247_v23  }
  0x14   :  { %1514 = vperm.xlu1 %2674, %v1506_v44  }
  0x15   :  { %2591 = vmatprep.mubr.msk.f32.mxu0 %vm79_vm1, %v2524_v22 }
  0x16   :  { %2592 = vmatmul.mubr.msk.f32.vlgmr.msra.gmra.mrb[0].mxu0 %vm79_vm1, %v2525_v27 }
  0x17   :  { %2602 = vmatpush1.bf16.msra.mxu0 %v2601_v24  ;;  %809 = vmatprep.mubr.f32.mxu0 %v2785_v30 }
  0x18   :  { %1271 = vperm.xlu0 %2673, %v1267_v32   ;;  %2034 = vperm.xlu1 %2674, %v2026_v45  }
  0x1a   :  { %2551 = vmatmul.mubr.msk.f32.vlgmr.msra.gmra.mrb[2].mxu0 %vm589_vm2, %v725_v31 }
  0x1b   :  { %815 = vmatprep.mubr.f32.mxu0 %v2785_v30 }
  0x1c   :  { %1509 = vperm.xlu0 %2673, %v1505_v34   ;;  %2054 = vperm.xlu1 %2674, %v2046_v46  }
  0x1e   :  { %2552 = vmatmul.mubr.msk.f32.gmra.mrb[4].mxu0 %vm589_vm2, %v726_v33 }
  0x1f   :  { %971 = vmatprep.mubr.f32.mxu0 %v2785_v30 }
  0x20   :  { %2029 = vperm.xlu0 %2673, %v2025_v35   ;;  %2291 = vperm.xlu1 %2674, %v2285_v47   ;;  %v2787_v35 = vmov 2475754826  }
  0x24   :  { %2049 = vperm.xlu0 %2673, %v2045_v37   ;;  %2301 = vperm.xlu1 %2674, %v2287_v48   ;;  %v2788_v37 = vmov 2131351028  }
  0x28   :  { %2676 = vperm.xlu0 %2673, %v2675_v39   ;;  %v3058_v39 = vld [vmem:[%s3600_s10] sm:$0xff] }
  0x2c   :  { %2296 = vperm.xlu0 %2673, %v2286_v40   ;;  %v2789_v40 = vmov 2102212464  }
  0x30   :  { %2306 = vperm.xlu0 %2673, %v2288_v41  }
  0x83   :  { %v3017_v59 = vpop.permute.xlu1 %731 }
  0x87   :  { %v3031_v9 = vpop.permute.xlu1 %736 }
  0x8a   :  { %v618_v51 = vpop.permute.xlu0 %617 }
  0x8b   :  { %vm622_vm6 = vcmp.eq.s32.totalorder %v613_v50, %v618_v51 }
  0x8c   :  { %v2547_v54 = vsel %vm622_vm6, 1.0, %v2785_v30 }
  0x8d   :  { %2596 = vmatprep.mubr.msk.f32.mxu1 %vm629_vm5, %v2547_v54 }
  0x8e   :  { %v621_v55 = vpop.permute.xlu0 %620 }
  0x8f   :  { %vm623_vm7 = vcmp.eq.s32.totalorder %v613_v50, %v621_v55  ;;  %v2791_v50 = vmov 1326507024  }
  0x90   :  { %v2548_v57 = vsel %vm623_vm7, 1.0, %v2785_v30 }
  0x91   :  { %2597 = vmatmul.mubr.msk.f32.vlgmr.msra.gmra.mrb[0].mxu1 %vm629_vm5, %v2548_v57 }
  0x92   :  { %2606 = vmatpush1.bf16.msra.mxu1 %v2605_v56  ;;  %886 = vmatprep.mubr.f32.mxu1 %v2785_v30  ;;  %v3069_v56 = vld [vmem:[%s3600_s10 + $0x8] sm:$0xff]  ;;  %s2792_s10 = smov 16  }
  0x95   :  { %2553 = vmatmul.mubr.msk.f32.vlgmr.msra.gmra.mrb[2].mxu1 %vm589_vm2, %v725_v31 }
  0x96   :  { %892 = vmatprep.mubr.f32.mxu1 %v2785_v30 }
  0x99   :  { %2554 = vmatmul.mubr.msk.f32.gmra.mrb[4].mxu1 %vm589_vm2, %v726_v33  ;;  %v2786_v33 = vmov 683565275  }
  0x9a   :  { %1048 = vmatprep.mubr.f32.mxu1 %v2785_v30 }
  0xe9   :  { %v2593_v58 = vpop.f32.mrb[0].mxu0 }
  0xea   :  { %v3019_v60 = vmul.f32 6.2831855, %v2593_v58  ;;  %v156_v61 = vpop.f32.mrb[1].mxu0 }
  0xeb   :  { %v3021_v62 = vmul.f32 6.2831855, %v156_v61 }
  0xec   :  { %v271_v63 = vand.u32 2147483647, %v3019_v60  ;;  %v274_v0 = vand.u32 2139095040, %v3019_v60  ;;  %vm273_vm7 = vcmp.lt.s32.totalorder %v3019_v60, 0 }
  0xed   :  { %v167_v1 = vand.u32 2147483647, %v3021_v62  ;;  %v170_v2 = vand.u32 2139095040, %v3021_v62  ;;  %v811_v3 = vpop.f32.mrb[2].mxu0 }
  0xee   :  { %v275_v4 = vshrl.u32 %v274_v0, 23  ;;  %v813_v5 = vpop.f32.mrb[3].mxu0  ;;  %v278_v6 = vand.u32 8388607, %v271_v63  ;;  %v3034_v11 = vadd.f32 %v811_v3, %v3017_v59 }
  0xef   :  { %v171_v7 = vshrl.u32 %v170_v2, 23  ;;  %v174_v8 = vand.u32 8388607, %v167_v1  ;;  %v3037_v13 = vadd.f32 %v813_v5, %v3017_v59 }
  0xf0   :  { %v2533_v10 = vadd.s32 4294967169, %v275_v4  ;;  %v279_v18 = vor.u32 8388608, %v278_v6 }
  0xf1   :  { %v2529_v12 = vadd.s32 4294967169, %v171_v7  ;;  %v817_v14 = vpop.f32.mrb[4].mxu0  ;;  %v175_v19 = vor.u32 8388608, %v174_v8 }
  0xf2   :  { %v281_v15 = vadd.s32 1, %v2533_v10  ;;  %v3040_v16 = vadd.f32 %v817_v14, %v3031_v9  ;;  %v819_v17 = vpop.f32.mrb[5].mxu0  ;;  %v3049_v28 = vshll.u32 %v279_v18, 8 }
  0xf3   :  { %v177_v20 = vadd.s32 1, %v2529_v12  ;;  %v3043_v21 = vadd.f32 %v819_v17, %v3031_v9  ;;  %v3053_v31 = vshll.u32 %v175_v19, 8 }
  0xf4   :  { %vm282_vm8 = vcmp.gt.s32.totalorder %v281_v15, 0  ;;  %v2609_v22 = vpack.c.bf16 %v3040_v16, %v3034_v11 }
  0xf5   :  { %v283_v23 = vsel %vm282_vm8, %v281_v15, 0  ;;  %vm178_vm9 = vcmp.gt.s32.totalorder %v177_v20, 0  ;;  %v2607_v24 = vpack.c.bf16 %v3043_v21, %v3037_v13  ;;  %vm272_vm8 = vcmp.le.f32.partialorder %v271_v63, 0.7853982 }
  0xf6   :  { %v284_v25 = vshrl.u32 %v283_v23, 5  ;;  %v285_v26 = vand.u32 31, %v283_v23  ;;  %v179_v27 = vsel %vm178_vm9, %v177_v20, 0  ;;  %vm169_vm9 = vcmp.lt.s32.totalorder %v3021_v62, 0 }
  0xf7   :  { %v3051_v29 = vand.u32 31, %v179_v27  ;;  %2608 = vmatprep.subr.bf16.mxu0 %v2607_v24  ;;  %v3060_v44 = vshrl.u32 %v179_v27, 5 }
  0xf8   :  { %v286_v32 = vsub.s32 32, %v285_v26  ;;  %v288_v34 = vshll.u32 %v2786_v33, %v285_v26  ;;  %v291_v36 = vshll.u32 %v2787_v35, %v285_v26  ;;  %v294_v38 = vshll.u32 %v2788_v37, %v285_v26  ;;  %2610 = vmatpush1.bf16.msra.mxu0 %v2609_v22 }
  0xf9   :  { %v297_v41 = vshll.u32 %v2789_v40, %v285_v26  ;;  %v300_v43 = vshll.u32 %v2790_v42, %v285_v26  ;;  %vm303_vm10 = vcmp.lt.s32.totalorder %v284_v25, 1  ;;  %vm304_vm11 = vcmp.lt.s32.totalorder %v284_v25, 2 }
  0xfa   :  { %v287_v45 = vshrl.u32 %v2786_v33, %v286_v32  ;;  %v289_v46 = vshrl.u32 %v2787_v35, %v286_v32  ;;  %v292_v47 = vshrl.u32 %v2788_v37, %v286_v32  ;;  %v295_v48 = vshrl.u32 %v2789_v40, %v286_v32 }
  0xfb   :  { %v298_v49 = vshrl.u32 %v2790_v42, %v286_v32  ;;  %v301_v51 = vshrl.u32 %v2791_v50, %v286_v32  ;;  %vm306_vm12 = vcmp.lt.s32.totalorder %v284_v25, 4  ;;  %2555 = vmatmul.mubr.msk.f32.vlgmr.msra.gmra.mrb[6].mxu0 %vm589_vm2, %v3058_v39  ;;  %v182_v55 = vsub.s32 32, %v3051_v29 }
  0xfc   :  { %v290_v52 = vor.u32 %v289_v46, %v288_v34  ;;  %v293_v53 = vor.u32 %v292_v47, %v291_v36  ;;  %v296_v54 = vor.u32 %v295_v48, %v294_v38  ;;  %977 = vmatprep.mubr.f32.mxu0 %v2785_v30  ;;  %vm305_vm13 = vcmp.lt.s32.totalorder %v284_v25, 3 }
  0xfd   :  { %v299_v57 = vor.u32 %v298_v49, %v297_v41  ;;  %v302_v58 = vor.u32 %v301_v51, %v300_v43  ;;  %v184_v61 = vshll.u32 %v2786_v33, %v3051_v29  ;;  %v187_v8 = vshll.u32 %v2787_v35, %v3051_v29 }
  0xfe   :  { %v307_v0 = vsel %vm303_vm10, %v287_v45, %v290_v52  ;;  %v308_v2 = vsel %vm306_vm12, %v296_v54, 2102212464  ;;  %v311_v3 = vsel %vm303_vm10, %v290_v52, %v293_v53  ;;  %v315_v4 = vsel %vm303_vm10, %v293_v53, %v296_v54 }
  0xff   :  { %v309_v5 = vsel %vm305_vm13, %v293_v53, %v308_v2  ;;  %v312_v6 = vsel %vm306_vm12, %v299_v57, 920167782  ;;  %v316_v7 = vsel %vm306_vm12, %v302_v58, 1326507024  ;;  %2556 = vmatmul.mubr.msk.f32.gmra.mrb[8].mxu0 %vm589_vm2, %v3069_v56  ;;  %v183_v14 = vshrl.u32 %v2786_v33, %v182_v55 }
 0x100   :  { %v313_v10 = vsel %vm305_vm13, %v296_v54, %v312_v6  ;;  %v317_v12 = vsel %vm305_vm13, %v299_v57, %v316_v7  ;;  %v185_v15 = vshrl.u32 %v2787_v35, %v182_v55  ;;  %1141 = vmatprep.mubr.f32.mxu0 %v2785_v30  ;;  %v310_v17 = vsel %vm304_vm11, %v307_v0, %v309_v5 }
 0x101   :  { %v314_v18 = vsel %vm304_vm11, %v311_v3, %v313_v10  ;;  %v318_v19 = vsel %vm304_vm11, %v315_v4, %v317_v12  ;;  %v188_v20 = vshrl.u32 %v2788_v37, %v182_v55  ;;  %v190_v33 = vshll.u32 %v2788_v37, %v3051_v29 }
 0x102   :  { %v3086_v22 = vmul.u32.u64.low %v3049_v28, %v318_v19  ;;  %v3087_v23 = vmul.u32.u64.high %v3049_v28, %v318_v19, %v3086_v22  ;;  %v3090_v24 = vmul.u32.u64.low %v3049_v28, %v314_v18  ;;  %v3091_v26 = vmul.u32.u64.high %v3049_v28, %v314_v18, %v3090_v24 }
 0x103   :  { %v186_v27 = vor.u32 %v185_v15, %v184_v61  ;;  %v189_v32 = vor.u32 %v188_v20, %v187_v8  ;;  %v191_v34 = vshrl.u32 %v2789_v40, %v182_v55  ;;  %v193_v35 = vshll.u32 %v2789_v40, %v3051_v29 }
 0x104   :  { %v194_v36 = vshrl.u32 %v2790_v42, %v182_v55  ;;  %v196_v25 = vshll.u32 %v2790_v42, %v3051_v29  ;;  %v197_v38 = vshrl.u32 %v2791_v50, %v182_v55  ;;  %v326_v41 = vmul.u32 %v3049_v28, %v310_v17 }
 0x105   :  { %v192_v43 = vor.u32 %v191_v34, %v190_v33  ;;  %vm199_vm14 = vcmp.lt.s32.totalorder %v3060_v44, 1  ;;  %vm200_vm15 = vcmp.lt.s32.totalorder %v3060_v44, 2  ;;  %vm328_vm0 = vc.u32 %v3087_v23, %v3090_v24 }
 0x106   :  { %v329_v45 = vadd.s32 1, %v3091_v26  ;;  %v195_v46 = vor.u32 %v194_v36, %v193_v35  ;;  %vm201_vm1 = vcmp.lt.s32.totalorder %v3060_v44, 3  ;;  %v198_v37 = vor.u32 %v197_v38, %v196_v25 }
 0x107   :  { %vm202_vm3 = vcmp.lt.s32.totalorder %v3060_v44, 4  ;;  %v203_v40 = vsel %vm199_vm14, %v183_v14, %v186_v27  ;;  %v207_v29 = vsel %vm199_vm14, %v186_v27, %v189_v32  ;;  %v211_v48 = vsel %vm199_vm14, %v189_v32, %v192_v43 }
 0x108   :  { %v330_v42 = vsel %vm328_vm0, %v329_v45, %v3091_v26  ;;  %v204_v28 = vsel %vm202_vm3, %v192_v43, 2102212464  ;;  %v208_v47 = vsel %vm202_vm3, %v195_v46, 920167782  ;;  %v212_v52 = vsel %vm202_vm3, %v198_v37, 1326507024 }
 0x109   :  { %v331_v49 = vadd.s32 %v330_v42, %v326_v41  ;;  %v205_v50 = vsel %vm201_vm1, %v189_v32, %v204_v28  ;;  %v209_v51 = vsel %vm201_vm1, %v192_v43, %v208_v47  ;;  %v213_v55 = vsel %vm201_vm1, %v195_v46, %v212_v52 }
 0x10a   :  { %v206_v53 = vsel %vm200_vm15, %v203_v40, %v205_v50  ;;  %v210_v54 = vsel %vm200_vm15, %v207_v29, %v209_v51  ;;  %v214_v58 = vsel %vm200_vm15, %v211_v48, %v213_v55  ;;  %v327_v26 = vadd.s32 %v3090_v24, %v3087_v23 }
 0x10b   :  { %v332_v57 = vadd.s32 536870912, %v331_v49  ;;  %v3111_v61 = vmul.u32.u64.low %v3053_v31, %v210_v54  ;;  %v3112_v0 = vmul.u32.u64.high %v3053_v31, %v210_v54, %v3111_v61  ;;  %v222_v5 = vmul.u32 %v3053_v31, %v206_v53 }
 0x10c   :  { %v3115_v2 = vmul.u32.u64.low %v3053_v31, %v214_v58  ;;  %v3116_v3 = vmul.u32.u64.high %v3053_v31, %v214_v58, %v3115_v2  ;;  %vm168_vm10 = vcmp.le.f32.partialorder %v167_v1, 0.7853982  ;;  %vm363_vm1 = vweird.f32 %v3019_v60 }
 0x10d   :  { %v333_v4 = vshrl.u32 %v332_v57, 30  ;;  %v225_v7 = vadd.s32 1, %v3112_v0 }
 0x10e   :  { %vm224_vm4 = vc.u32 %v3116_v3, %v3111_v61  ;;  %v223_v40 = vadd.s32 %v3111_v61, %v3116_v3 }
 0x10f   :  { %v334_v6 = vshll.u32 %v333_v4, 30  ;;  %v226_v44 = vsel %vm224_vm4, %v225_v7, %v3112_v0  ;;  %v357_v48 = vsub.s32 4, %v333_v4 }
 0x110   :  { %v227_v10 = vadd.s32 %v226_v44, %v222_v5 }
 0x111   :  { %v335_v8 = vsub.s32 %v331_v49, %v334_v6  ;;  %v358_v55 = vsel %vm273_vm7, %v357_v48, %v333_v4 }
 0x112   :  { %v228_v14 = vadd.s32 536870912, %v227_v10  ;;  %v360_v2 = vsel %vm272_vm8, 0, %v358_v55 }
 0x113   :  { %v337_v12 = vsub.s32 0, %v335_v8  ;;  %v364_v3 = vadd.s32 3, %v360_v2 }
 0x114   :  { %v229_v17 = vshrl.u32 %v228_v14, 30 }
 0x115   :  { %v2534_v15 = vmin.u32 %v337_v12, %v335_v8  ;;  %v365_v63 = vand.u32 3, %v364_v3 }
 0x116   :  { %v230_v19 = vshll.u32 %v229_v17, 30  ;;  %v253_v6 = vsub.s32 4, %v229_v17 }
 0x117   :  { %v339_v18 = vclz %v2534_v15  ;;  %vm370_vm11 = vcmp.eq.s32.totalorder %v365_v63, 2  ;;  %vm367_vm13 = vcmp.eq.s32.totalorder %v365_v63, 0  ;;  %vm366_vm15 = vcmp.lt.s32.totalorder %v365_v63, 2 }
 0x118   :  { %v231_v22 = vsub.s32 %v227_v10, %v230_v19  ;;  %v254_v44 = vsel %vm169_vm9, %v253_v6, %v229_v17 }
 0x119   :  { %v2535_v20 = vadd.s32 4294967294, %v339_v18  ;;  %v256_v14 = vsel %vm168_vm10, 0, %v254_v44 }
 0x11a   :  { %v233_v27 = vsub.s32 0, %v231_v22  ;;  %v260_v19 = vadd.s32 3, %v256_v14 }
 0x11b   :  { %vm2536_vm5 = vcmp.lt.s32.totalorder %v2535_v20, 0 }
 0x11c   :  { %v342_v31 = vsel %vm2536_vm5, 0, %v2535_v20  ;;  %v2530_v35 = vmin.u32 %v233_v27, %v231_v22 }
 0x11d   :  { %v343_v32 = vsub.s32 32, %v342_v31  ;;  %v344_v33 = vshll.u32 %v335_v8, %v342_v31  ;;  %v347_v34 = vsub.s32 4294967266, %v342_v31  ;;  %v571_v8 = vand.u32 3, %v360_v2 }
 0x11e   :  { %v235_v38 = vclz %v2530_v35 }
 0x11f   :  { %v345_v36 = vshrl.u32 %v327_v26, %v343_v32  ;;  %v348_v25 = vadd.s32 127, %v347_v34  ;;  %vm576_vm12 = vcmp.eq.s32.totalorder %v571_v8, 2  ;;  %vm573_vm14 = vcmp.eq.s32.totalorder %v571_v8, 0 }
 0x120   :  { %v2531_v45 = vadd.s32 4294967294, %v235_v38  ;;  %vm572_vm0 = vcmp.lt.s32.totalorder %v571_v8, 2  ;;  %v261_v32 = vand.u32 3, %v260_v19 }
 0x121   :  { %v346_v41 = vor.u32 %v345_v36, %v344_v33  ;;  %v349_v43 = vshll.u32 %v348_v25, 23  ;;  %v468_v33 = vand.u32 3, %v256_v14 }
 0x122   :  { %vm2532_vm6 = vcmp.lt.s32.totalorder %v2531_v45, 0  ;;  %vm266_vm3 = vcmp.eq.s32.totalorder %v261_v32, 2  ;;  %vm263_vm5 = vcmp.eq.s32.totalorder %v261_v32, 0 }
 0x123   :  { %v350_v46 = vor.u32 4788187, %v349_v43  ;;  %v353_v37 = vcvt.s32.f32 %v346_v41  ;;  %v238_v23 = vsel %vm2532_vm6, 0, %v2531_v45  ;;  %vm473_vm4 = vcmp.eq.s32.totalorder %v468_v33, 2 }
 0x124   :  { %v239_v24 = vsub.s32 32, %v238_v23  ;;  %v240_v42 = vshll.u32 %v231_v22, %v238_v23  ;;  %v243_v28 = vsub.s32 4294967266, %v238_v23  ;;  %vm470_vm6 = vcmp.eq.s32.totalorder %v468_v33, 0 }
 0x125   :  { %v351_v29 = vand.u32 2147483647, %v350_v46 }
 0x126   :  { %v241_v49 = vshrl.u32 %v223_v40, %v239_v24  ;;  %v244_v50 = vadd.s32 127, %v243_v28 }
 0x127   :  { %v354_v47 = vmul.f32 %v353_v37, %v351_v29 }
 0x128   :  { %v242_v52 = vor.u32 %v241_v49, %v240_v42  ;;  %v245_v53 = vshll.u32 %v244_v50, 23 }
 0x129   :  { %v355_v51 = vxor.u32 2147483648, %v354_v47 }
 0x12a   :  { %v246_v57 = vor.u32 4788187, %v245_v53  ;;  %v249_v58 = vcvt.s32.f32 %v242_v52 }
 0x12b   :  { %v356_v54 = vsel %vm273_vm7, %v355_v51, %v354_v47  ;;  %vm262_vm7 = vcmp.lt.s32.totalorder %v261_v32, 2 }
 0x12c   :  { %v359_v61 = vsel %vm272_vm8, %v3019_v60, %v356_v54  ;;  %v247_v0 = vand.u32 2147483647, %v246_v57  ;;  %vm469_vm8 = vcmp.lt.s32.totalorder %v468_v33, 2  ;;  %v3162_v57 = vpop.permute.xlu1 %1256 }
 0x12d   :  { %2680 = vcosq.f32 %v359_v61 }
 0x12e   :  { %2682 = vsinq.f32 %v359_v61  ;;  %v250_v5 = vmul.f32 %v249_v58, %v247_v0 }
 0x130   :  { %v251_v7 = vxor.u32 2147483648, %v250_v5  ;;  %v3166_v61 = vpop.permute.xlu1 %1276 }
 0x132   :  { %v252_v4 = vsel %vm169_vm9, %v251_v7, %v250_v5  ;;  %vm259_vm9 = vweird.f32 %v3021_v62 }
 0x133   :  { %v255_v10 = vsel %vm168_vm10, %v3021_v62, %v252_v4  ;;  %vm715_vm10 = vcmask 254976  }
 0x134   :  { %2684 = vcosq.f32 %v255_v10  ;;  %v3170_v2 = vpop.permute.xlu1 %1514 }
 0x135   :  { %2686 = vsinq.f32 %v255_v10 }
 0x137   :  { %v2681_v12 = vpop.eup %2680 }
 0x138   :  { %v2683_v15 = vpop.eup %2682  ;;  %v371_v18 = vxor.u32 2147483648, %v2681_v12  ;;  %v3172_v5 = vpop.permute.xlu1 %2034 }
 0x139   :  { %v368_v20 = vxor.u32 2147483648, %v2683_v15 }
 0x13a   :  { %v578_v1 = vsel %vm576_vm12, %v371_v18, %v2683_v15  ;;  %v372_v17 = vsel %vm370_vm11, %v371_v18, %v2683_v15  ;;  %vm713_vm11 = vcmask 261120  }
 0x13b   :  { %v575_v22 = vsel %vm573_vm14, %v2681_v12, %v368_v20  ;;  %v369_v26 = vsel %vm367_vm13, %v2681_v12, %v368_v20 }
 0x13c   :  { %v579_v31 = vsel %vm572_vm0, %v575_v22, %v578_v1  ;;  %v373_v27 = vsel %vm366_vm15, %v369_v26, %v372_v17  ;;  %v3176_v7 = vpop.permute.xlu1 %2054 }
 0x13d   :  { %v580_v34 = vsel %vm363_vm1, nan, %v579_v31  ;;  %v374_v35 = vsel %vm363_vm1, nan, %v373_v27 }
 0x13e   :  { %585 = vrot.lane.b32.xlu0 %v580_v34, %s2792_s10  ;;  %v2685_v36 = vpop.eup %2684 }
 0x13f   :  { %v2687_v25 = vpop.eup %2686  ;;  %v267_v38 = vxor.u32 2147483648, %v2685_v36 }
 0x140   :  { %v264_v60 = vxor.u32 2147483648, %v2687_v25  ;;  %v3180_v8 = vpop.permute.xlu1 %2291 }
 0x141   :  { %v475_v41 = vsel %vm473_vm4, %v267_v38, %v2687_v25  ;;  %v268_v43 = vsel %vm266_vm3, %v267_v38, %v2687_v25 }
 0x142   :  { %v472_v45 = vsel %vm470_vm6, %v2685_v36, %v264_v60  ;;  %v265_v46 = vsel %vm263_vm5, %v2685_v36, %v264_v60 }
 0x143   :  { %v476_v37 = vsel %vm469_vm8, %v472_v45, %v475_v41  ;;  %v269_v40 = vsel %vm262_vm7, %v265_v46, %v268_v43 }
 0x144   :  { %v477_v29 = vsel %vm259_vm9, nan, %v476_v37  ;;  %v270_v23 = vsel %vm259_vm9, nan, %v269_v40  ;;  %v3183_v15 = vpop.permute.xlu1 %2301 }
 0x145   :  { %583 = vrot.lane.b32.xlu1 %v477_v29, %s2792_s10 }
 0x164   :  { %v2598_v24 = vpop.f32.mrb[0].mxu1 }
 0x165   :  { %v702_v42 = vpop.f32.mrb[1].mxu1 }
 0x168   :  { %v888_v28 = vpop.f32.mrb[2].mxu1 }
 0x169   :  { %v890_v47 = vpop.f32.mrb[3].mxu1  ;;  %v3144_v52 = vadd.f32 %v888_v28, %v3017_v59 }
 0x16a   :  { %v3138_v62 = vadd.f32 %v890_v47, %v3017_v59  ;;  %v3156_v59 = vpop.permute.xlu0 %1251 }
 0x16c   :  { %v894_v48 = vpop.f32.mrb[4].mxu1 }
 0x16d   :  { %v3135_v49 = vadd.f32 %v894_v48, %v3031_v9  ;;  %v896_v50 = vpop.f32.mrb[5].mxu1 }
 0x16e   :  { %v3141_v51 = vadd.f32 %v896_v50, %v3031_v9  ;;  %v3158_v9 = vpop.permute.xlu0 %1271 }
 0x16f   :  { %v2613_v54 = vpack.c.bf16 %v3135_v49, %v3144_v52 }
 0x170   :  { %v2611_v53 = vpack.c.bf16 %v3141_v51, %v3138_v62 }
 0x172   :  { %2612 = vmatprep.subr.bf16.mxu1 %v2611_v53  ;;  %v3160_v55 = vpop.permute.xlu0 %1509 }
 0x173   :  { %2614 = vmatpush1.bf16.msra.mxu1 %v2613_v54 }
 0x176   :  { %2557 = vmatmul.mubr.msk.f32.vlgmr.msra.gmra.mrb[6].mxu1 %vm589_vm2, %v3058_v39  ;;  %v3164_v58 = vpop.permute.xlu0 %2029 }
 0x177   :  { %1054 = vmatprep.mubr.f32.mxu1 %v2785_v30 }
 0x17a   :  { %2558 = vmatmul.mubr.msk.f32.gmra.mrb[8].mxu1 %vm589_vm2, %v3069_v56  ;;  %v3168_v0 = vpop.permute.xlu0 %2049 }
 0x17b   :  { %1218 = vmatprep.mubr.f32.mxu1 %v2785_v30 }
 0x17e   :  { %v2677_v3 = vpop.permute.xlu0 %2676 }
 0x17f   :  { %v2679_v4 = vunpack.i.h.bf16 %v2677_v3  ;;  %v2678_v18 = vunpack.i.l.bf16 %v2677_v3 }
 0x182   :  { %v3174_v6 = vpop.permute.xlu0 %2296 }
 0x186   :  { %v3178_v63 = vpop.permute.xlu0 %2306 }
 0x1b0   :  { %v586_v44 = vpop.permute.xlu0 %585 }
 0x1b1   :  { %v591_v10 = vsel %vm589_vm2, %v374_v35, %v586_v44 }
 0x1b2   :  { %v611_v12 = vmul.f32 %v2679_v4, %v591_v10 }
 0x1b4   :  { %v712_v14 = vadd.f32 %v2598_v24, %v611_v12 }
 0x1b6   :  { %716 = vst.msk [vmem:[%s3601_s18 + $0x8] sm:$0x3] %vm715_vm10, %v712_v14 }
 0x1b7   :  { %v584_v19 = vpop.permute.xlu1 %583 }
 0x1b8   :  { %v590_v20 = vsel %vm589_vm2, %v270_v23, %v584_v19 }
 0x1b9   :  { %v610_v1 = vmul.f32 %v2678_v18, %v590_v20 }
 0x1bb   :  { %v711_v17 = vadd.f32 %v702_v42, %v610_v1 }
 0x1bd   :  { %714 = vst.msk [vmem:[%s3601_s18] sm:$0xff] %vm713_vm11, %v711_v17 }
 0x1ce   :  { %v973_v22 = vpop.f32.mrb[6].mxu0 }
 0x1cf   :  { %v975_v26 = vpop.f32.mrb[7].mxu0  ;;  %v1061_v32 = vsub.f32 %v3034_v11, %v973_v22 }
 0x1d0   :  { %v1062_v31 = vsub.f32 %v3037_v13, %v975_v26 }
 0x1d1   :  { %v1069_v60 = vmul.f32 %v1061_v32, %v1061_v32 }
 0x1d2   :  { %v979_v27 = vpop.f32.mrb[8].mxu0  ;;  %v1070_v25 = vmul.f32 %v1062_v31, %v1062_v31 }
 0x1d3   :  { %v1065_v33 = vsub.f32 %v3040_v16, %v979_v27  ;;  %v981_v34 = vpop.f32.mrb[9].mxu0 }
 0x1d4   :  { %v1066_v35 = vsub.f32 %v3043_v21, %v981_v34 }
 0x1d5   :  { %v1073_v36 = vmul.f32 %v1065_v33, %v1065_v33 }
 0x1d6   :  { %v1074_v38 = vmul.f32 %v1066_v35, %v1066_v35 }
 0x1d7   :  { %v2617_v43 = vpack.c.bf16 %v1073_v36, %v1069_v60 }
 0x1d8   :  { %v2615_v41 = vpack.c.bf16 %v1074_v38, %v1070_v25 }
 0x1da   :  { %2616 = vmatprep.subr.bf16.mxu0 %v2615_v41 }
 0x1db   :  { %2618 = vmatpush1.bf16.msra.mxu0 %v2617_v43 }
 0x1de   :  { %2559 = vmatmul.mubr.msk.f32.vlgmr.msra.gmra.mrb[10].mxu0 %vm589_vm2, %v3058_v39 }
 0x1df   :  { %1147 = vmatprep.mubr.f32.mxu0 %v2785_v30 }
 0x1e2   :  { %2560 = vmatmul.mubr.msk.f32.gmra.mrb[12].mxu0 %vm589_vm2, %v3069_v56 }
 0x1e3   :  { %1587 = vmatprep.mubr.f32.mxu0 %v2785_v30 }
 0x249   :  { %v1050_v11 = vpop.f32.mrb[6].mxu1 }
 0x24a   :  { %v1052_v13 = vpop.f32.mrb[7].mxu1  ;;  %v3206_v45 = vsub.f32 %v3144_v52, %v1050_v11 }
 0x24b   :  { %v3203_v16 = vsub.f32 %v3138_v62, %v1052_v13 }
 0x24c   :  { %v1071_v42 = vmul.f32 %v3206_v45, %v3206_v45 }
 0x24d   :  { %v1056_v21 = vpop.f32.mrb[8].mxu1  ;;  %v1072_v23 = vmul.f32 %v3203_v16, %v3203_v16 }
 0x24e   :  { %v3209_v46 = vsub.f32 %v3135_v49, %v1056_v21  ;;  %v1058_v37 = vpop.f32.mrb[9].mxu1 }
 0x24f   :  { %v3212_v40 = vsub.f32 %v3141_v51, %v1058_v37 }
 0x250   :  { %v1075_v29 = vmul.f32 %v3209_v46, %v3209_v46 }
 0x251   :  { %v1076_v24 = vmul.f32 %v3212_v40, %v3212_v40 }
 0x252   :  { %v2621_v47 = vpack.c.bf16 %v1075_v29, %v1071_v42 }
 0x253   :  { %v2619_v28 = vpack.c.bf16 %v1076_v24, %v1072_v23 }
 0x255   :  { %2620 = vmatprep.subr.bf16.mxu1 %v2619_v28 }
 0x256   :  { %2622 = vmatpush1.bf16.msra.mxu1 %v2621_v47 }
 0x259   :  { %2561 = vmatmul.mubr.msk.f32.vlgmr.msra.gmra.mrb[10].mxu1 %vm589_vm2, %v3058_v39 }
 0x25a   :  { %1224 = vmatprep.mubr.f32.mxu1 %v2785_v30 }
 0x25d   :  { %2562 = vmatmul.mubr.msk.f32.gmra.mrb[12].mxu1 %vm589_vm2, %v3069_v56 }
 0x25e   :  { %1664 = vmatprep.mubr.f32.mxu1 %v2785_v30 }
 0x2b1   :  { %v1143_v48 = vpop.f32.mrb[10].mxu0 }
 0x2b2   :  { %v1144_v49 = vadd.f32 1e-06, %v1143_v48  ;;  %v1145_v50 = vpop.f32.mrb[11].mxu0 }
 0x2b3   :  { %v1146_v62 = vadd.f32 1e-06, %v1145_v50 }
 0x2b4   :  { %2688 = vrsqrt.f32 %v1144_v49 }
 0x2b5   :  { %2690 = vrsqrt.f32 %v1146_v62  ;;  %v1149_v51 = vpop.f32.mrb[12].mxu0 }
 0x2b6   :  { %v1150_v52 = vadd.f32 1e-06, %v1149_v51  ;;  %v1151_v53 = vpop.f32.mrb[13].mxu0 }
 0x2b7   :  { %v1152_v54 = vadd.f32 1e-06, %v1151_v53 }
 0x2b8   :  { %2692 = vrsqrt.f32 %v1150_v52 }
 0x2b9   :  { %2694 = vrsqrt.f32 %v1152_v54 }
 0x2be   :  { %v2689_v39 = vpop.eup %2688 }
 0x2bf   :  { %v2691_v3 = vpop.eup %2690  ;;  %v1239_v4 = vmul.f32 %v2689_v39, %v1061_v32 }
 0x2c0   :  { %v1240_v44 = vmul.f32 %v2691_v3, %v1062_v31 }
 0x2c1   :  { %v1259_v56 = vmul.f32 %v3156_v59, %v1239_v4 }
 0x2c2   :  { %v2693_v10 = vpop.eup %2692  ;;  %v1260_v12 = vmul.f32 %v3156_v59, %v1240_v44 }
 0x2c3   :  { %v2695_v14 = vpop.eup %2694  ;;  %v1243_v18 = vmul.f32 %v2693_v10, %v1065_v33  ;;  %v3231_v19 = vadd.f32 %v3158_v9, %v1259_v56 }
 0x2c4   :  { %v1244_v20 = vmul.f32 %v2695_v14, %v1066_v35  ;;  %v3234_v1 = vadd.f32 %v3158_v9, %v1260_v12 }
 0x2c5   :  { %v1263_v17 = vmul.f32 %v3162_v57, %v1243_v18  ;;  %v3238_v22 = vmul.f32 0.70710677, %v3231_v19 }
 0x2c6   :  { %v1264_v26 = vmul.f32 %v3162_v57, %v1244_v20  ;;  %v3242_v31 = vmul.f32 0.70710677, %v3234_v1 }
 0x2c7   :  { %v3245_v27 = vadd.f32 %v3166_v61, %v1263_v17  ;;  %v1319_v32 = vand.u32 2147483647, %v3238_v22  ;;  %vm1303_vm12 = vcmp.ge.f32.partialorder %v3238_v22, 0.0 }
 0x2c8   :  { %v3249_v33 = vadd.f32 %v3166_v61, %v1264_v26  ;;  %v1320_v34 = vand.u32 2147483647, %v3242_v31  ;;  %vm1304_vm13 = vcmp.ge.f32.partialorder %v3242_v31, 0.0 }
 0x2c9   :  { %v3253_v35 = vmul.f32 0.70710677, %v3245_v27  ;;  %v1327_v36 = vmul.f32 0.3275911, %v1319_v32  ;;  %v1431_v23 = vsub.f32 0.0, %v1319_v32 }
 0x2ca   :  { %v3256_v25 = vmul.f32 0.70710677, %v3249_v33  ;;  %v1328_v38 = vmul.f32 0.3275911, %v1320_v34  ;;  %v1432_v24 = vsub.f32 0.0, %v1320_v34 }
 0x2cb   :  { %v1323_v60 = vand.u32 2147483647, %v3253_v35  ;;  %v1335_v41 = vadd.f32 1.0, %v1327_v36  ;;  %v1439_v47 = vmul.f32 %v1431_v23, %v1319_v32  ;;  %vm1307_vm14 = vcmp.ge.f32.partialorder %v3253_v35, 0.0 }
 0x2cc   :  { %v1324_v43 = vand.u32 2147483647, %v3256_v25  ;;  %v1336_v11 = vadd.f32 1.0, %v1328_v38  ;;  %v1440_v50 = vmul.f32 %v1432_v24, %v1320_v34  ;;  %vm1308_vm15 = vcmp.ge.f32.partialorder %v3256_v25, 0.0 }
 0x2cd   :  { %v1331_v13 = vmul.f32 0.3275911, %v1323_v60  ;;  %2696 = vrcp.f32 %v1335_v41  ;;  %v1435_v28 = vsub.f32 0.0, %v1323_v60  ;;  %v1447_v3 = vmul.f32 1.442695, %v1439_v47 }
 0x2ce   :  { %v1332_v21 = vmul.f32 0.3275911, %v1324_v43  ;;  %2698 = vrcp.f32 %v1336_v11  ;;  %v1436_v49 = vsub.f32 0.0, %v1324_v43  ;;  %v1449_v56 = vmul.f32 1.442695, %v1440_v50 }
 0x2cf   :  { %v1339_v37 = vadd.f32 1.0, %v1331_v13  ;;  %v1443_v39 = vmul.f32 %v1435_v28, %v1323_v60  ;;  %v1291_v35 = vmul.f32 0.5, %v3245_v27  ;;  %v1292_v25 = vmul.f32 0.5, %v3249_v33 }
 0x2d0   :  { %v1340_v29 = vadd.f32 1.0, %v1332_v21  ;;  %v1444_v44 = vmul.f32 %v1436_v49, %v1324_v43 }
 0x2d1   :  { %2700 = vrcp.f32 %v1339_v37  ;;  %v1455_v34 = vmul.f32 1.442695, %v1443_v39 }
 0x2d2   :  { %2702 = vrcp.f32 %v1340_v29  ;;  %v1457_v36 = vmul.f32 1.442695, %v1444_v44 }
 0x2d3   :  { %2704 = vpow2.f32 %v1447_v3 }
 0x2d4   :  { %2706 = vpow2.f32 %v1449_v56 }
 0x2d5   :  { %2708 = vpow2.f32 %v1455_v34  ;;  %v2793_v34 = vmov -1.0  }
 0x2d6   :  { %2710 = vpow2.f32 %v1457_v36 }
 0x2d7   :  { %v2697_v42 = vpop.eup %2696 }
 0x2d8   :  { %v2699_v48 = vpop.eup %2698  ;;  %v1359_v62 = vmul.f32 1.0614054, %v2697_v42 }
 0x2d9   :  { %v1360_v51 = vmul.f32 1.0614054, %v2699_v48 }
 0x2da   :  { %v1367_v52 = vadd.f32 -1.4531521, %v1359_v62 }
 0x2db   :  { %v2701_v53 = vpop.eup %2700  ;;  %v1368_v54 = vadd.f32 -1.4531521, %v1360_v51 }
 0x2dc   :  { %v2703_v4 = vpop.eup %2702  ;;  %v1363_v10 = vmul.f32 1.0614054, %v2701_v53  ;;  %v1375_v12 = vmul.f32 %v2697_v42, %v1367_v52 }
 0x2dd   :  { %v1364_v14 = vmul.f32 1.0614054, %v2703_v4  ;;  %v1376_v18 = vmul.f32 %v2699_v48, %v1368_v54  ;;  %v2705_v54 = vpop.eup %2704 }
 0x2de   :  { %v1371_v20 = vadd.f32 -1.4531521, %v1363_v10  ;;  %v1383_v17 = vadd.f32 1.4214138, %v1375_v12  ;;  %v2707_v44 = vpop.eup %2706 }
 0x2df   :  { %v1372_v26 = vadd.f32 -1.4531521, %v1364_v14  ;;  %v1384_v32 = vadd.f32 1.4214138, %v1376_v18 }
 0x2e0   :  { %v1379_v38 = vmul.f32 %v2701_v53, %v1371_v20  ;;  %v1391_v41 = vmul.f32 %v2697_v42, %v1383_v17  ;;  %v2709_v17 = vpop.eup %2708 }
 0x2e1   :  { %v1380_v11 = vmul.f32 %v2703_v4, %v1372_v26  ;;  %v1392_v60 = vmul.f32 %v2699_v48, %v1384_v32  ;;  %v2711_v36 = vpop.eup %2710 }
 0x2e2   :  { %v1387_v13 = vadd.f32 1.4214138, %v1379_v38  ;;  %v1399_v21 = vadd.f32 -0.28449672, %v1391_v41 }
 0x2e3   :  { %v1388_v43 = vadd.f32 1.4214138, %v1380_v11  ;;  %v1400_v37 = vadd.f32 -0.28449672, %v1392_v60  ;;  %v1315_v60 = vsel %vm1307_vm14, 1.0, %v2793_v34 }
 0x2e4   :  { %v1395_v29 = vmul.f32 %v2701_v53, %v1387_v13  ;;  %v1407_v23 = vmul.f32 %v2697_v42, %v1399_v21 }
 0x2e5   :  { %v1396_v24 = vmul.f32 %v2703_v4, %v1388_v43  ;;  %v1408_v28 = vmul.f32 %v2699_v48, %v1400_v37 }
 0x2e6   :  { %v1403_v47 = vadd.f32 -0.28449672, %v1395_v29  ;;  %v1415_v49 = vadd.f32 0.2548296, %v1407_v23  ;;  %v1287_v29 = vmul.f32 0.5, %v3231_v19  ;;  %v3275_v19 = vld [vmem:[%s3602_s11] sm:$0xff] }
 0x2e7   :  { %v1404_v50 = vadd.f32 -0.28449672, %v1396_v24  ;;  %v1416_v62 = vadd.f32 0.2548296, %v1408_v28  ;;  %v1288_v24 = vmul.f32 0.5, %v3234_v1  ;;  %v3283_v1 = vld [vmem:[%s3602_s11 + $0x8] sm:$0xff] }
 0x2e8   :  { %v1411_v51 = vmul.f32 %v2701_v53, %v1403_v47  ;;  %v1423_v52 = vmul.f32 %v2697_v42, %v1415_v49  ;;  %v1311_v42 = vsel %vm1303_vm12, 1.0, %v2793_v34 }
 0x2e9   :  { %v1412_v39 = vmul.f32 %v2703_v4, %v1404_v50  ;;  %v1424_v3 = vmul.f32 %v2699_v48, %v1416_v62  ;;  %v1312_v48 = vsel %vm1304_vm13, 1.0, %v2793_v34 }
 0x2ea   :  { %v1419_v56 = vadd.f32 0.2548296, %v1411_v51  ;;  %v1463_v10 = vmul.f32 %v2705_v54, %v1423_v52 }
 0x2eb   :  { %v1420_v12 = vadd.f32 0.2548296, %v1412_v39  ;;  %v1464_v14 = vmul.f32 %v2707_v44, %v1424_v3 }
 0x2ec   :  { %v1427_v18 = vmul.f32 %v2701_v53, %v1419_v56  ;;  %v1471_v20 = vsub.f32 1.0, %v1463_v10 }
 0x2ed   :  { %v1428_v26 = vmul.f32 %v2703_v4, %v1420_v12  ;;  %v1472_v32 = vsub.f32 1.0, %v1464_v14  ;;  %v1316_v4 = vsel %vm1308_vm15, 1.0, %v2793_v34 }
 0x2ee   :  { %v1467_v22 = vmul.f32 %v2709_v17, %v1427_v18  ;;  %v1479_v38 = vmul.f32 %v1471_v20, %v1311_v42 }
 0x2ef   :  { %v1468_v31 = vmul.f32 %v2711_v36, %v1428_v26  ;;  %v1480_v41 = vmul.f32 %v1472_v32, %v1312_v48 }
 0x2f0   :  { %v1475_v11 = vsub.f32 1.0, %v1467_v22  ;;  %v1487_v21 = vadd.f32 1.0, %v1479_v38 }
 0x2f1   :  { %v1476_v53 = vsub.f32 1.0, %v1468_v31  ;;  %v1488_v37 = vadd.f32 1.0, %v1480_v41 }
 0x2f2   :  { %v1483_v13 = vmul.f32 %v1475_v11, %v1315_v60  ;;  %v1495_v47 = vmul.f32 %v1487_v21, %v1287_v29 }
 0x2f3   :  { %v1484_v43 = vmul.f32 %v1476_v53, %v1316_v4  ;;  %v1496_v50 = vmul.f32 %v1488_v37, %v1288_v24 }
 0x2f4   :  { %v1491_v23 = vadd.f32 1.0, %v1483_v13 }
 0x2f5   :  { %v1492_v28 = vadd.f32 1.0, %v1484_v43 }
 0x2f6   :  { %v1499_v49 = vmul.f32 %v1491_v23, %v1291_v35 }
 0x2f7   :  { %v1500_v62 = vmul.f32 %v1492_v28, %v1292_v25 }
 0x2f8   :  { %v2625_v51 = vpack.c.bf16 %v1499_v49, %v1495_v47 }
 0x2f9   :  { %v2623_v52 = vpack.c.bf16 %v1500_v62, %v1496_v50 }
 0x2fb   :  { %2624 = vmatprep.subr.bf16.mxu0 %v2623_v52 }
 0x2fc   :  { %2626 = vmatpush1.bf16.msra.mxu0 %v2625_v51 }
 0x2ff   :  { %2563 = vmatmul.mubr.msk.f32.vlgmr.msra.gmra.mrb[14].mxu0 %vm589_vm2, %v3275_v19 }
 0x300   :  { %1593 = vmatprep.mubr.f32.mxu0 %v2785_v30 }
 0x303   :  { %2564 = vmatmul.mubr.msk.f32.gmra.mrb[16].mxu0 %vm589_vm2, %v3283_v1 }
 0x304   :  { %1749 = vmatprep.mubr.f32.mxu0 %v2785_v30 }
 0x32c   :  { %v1220_v27 = vpop.f32.mrb[10].mxu1 }
 0x32d   :  { %v1221_v33 = vadd.f32 1e-06, %v1220_v27  ;;  %v1222_v54 = vpop.f32.mrb[11].mxu1 }
 0x32e   :  { %v1223_v39 = vadd.f32 1e-06, %v1222_v54 }
 0x32f   :  { %2712 = vrsqrt.f32 %v1221_v33 }
 0x330   :  { %2714 = vrsqrt.f32 %v1223_v39  ;;  %v1226_v3 = vpop.f32.mrb[12].mxu1 }
 0x331   :  { %v1227_v44 = vadd.f32 1e-06, %v1226_v3  ;;  %v1228_v56 = vpop.f32.mrb[13].mxu1 }
 0x332   :  { %v1229_v10 = vadd.f32 1e-06, %v1228_v56 }
 0x333   :  { %2716 = vrsqrt.f32 %v1227_v44 }
 0x334   :  { %2718 = vrsqrt.f32 %v1229_v10 }
 0x339   :  { %v2713_v12 = vpop.eup %2712 }
 0x33a   :  { %v2715_v14 = vpop.eup %2714  ;;  %v1241_v18 = vmul.f32 %v2713_v12, %v3206_v45 }
 0x33b   :  { %v1242_v20 = vmul.f32 %v2715_v14, %v3203_v16 }
 0x33c   :  { %v1261_v17 = vmul.f32 %v3156_v59, %v1241_v18 }
 0x33d   :  { %v2717_v26 = vpop.eup %2716  ;;  %v1262_v32 = vmul.f32 %v3156_v59, %v1242_v20 }
 0x33e   :  { %v2719_v42 = vpop.eup %2718  ;;  %v1245_v36 = vmul.f32 %v2717_v26, %v3209_v46  ;;  %v3294_v48 = vadd.f32 %v3158_v9, %v1261_v17 }
 0x33f   :  { %v1246_v22 = vmul.f32 %v2719_v42, %v3212_v40  ;;  %v3298_v38 = vadd.f32 %v3158_v9, %v1262_v32 }
 0x340   :  { %v1265_v45 = vmul.f32 %v3162_v57, %v1245_v36  ;;  %v3302_v16 = vmul.f32 0.70710677, %v3294_v48 }
 0x341   :  { %v1266_v31 = vmul.f32 %v3162_v57, %v1246_v22  ;;  %v3306_v59 = vmul.f32 0.70710677, %v3298_v38 }
 0x342   :  { %v3309_v46 = vadd.f32 %v3166_v61, %v1265_v45  ;;  %v1321_v41 = vand.u32 2147483647, %v3302_v16  ;;  %vm1305_vm0 = vcmp.ge.f32.partialorder %v3302_v16, 0.0 }
 0x343   :  { %v3313_v40 = vadd.f32 %v3166_v61, %v1266_v31  ;;  %v1322_v9 = vand.u32 2147483647, %v3306_v59  ;;  %vm1306_vm1 = vcmp.ge.f32.partialorder %v3306_v59, 0.0 }
 0x344   :  { %v3317_v11 = vmul.f32 0.70710677, %v3309_v46  ;;  %v1329_v53 = vmul.f32 0.3275911, %v1321_v41  ;;  %v1433_v23 = vsub.f32 0.0, %v1321_v41 }
 0x345   :  { %v3320_v60 = vmul.f32 0.70710677, %v3313_v40  ;;  %v1330_v57 = vmul.f32 0.3275911, %v1322_v9  ;;  %v1434_v24 = vsub.f32 0.0, %v1322_v9 }
 0x346   :  { %v1325_v4 = vand.u32 2147483647, %v3317_v11  ;;  %v1337_v13 = vadd.f32 1.0, %v1329_v53  ;;  %v1441_v47 = vmul.f32 %v1433_v23, %v1321_v41  ;;  %vm1309_vm3 = vcmp.ge.f32.partialorder %v3317_v11, 0.0 }
 0x347   :  { %v1326_v21 = vand.u32 2147483647, %v3320_v60  ;;  %v1338_v43 = vadd.f32 1.0, %v1330_v57  ;;  %v1442_v62 = vmul.f32 %v1434_v24, %v1322_v9  ;;  %vm1310_vm4 = vcmp.ge.f32.partialorder %v3320_v60, 0.0 }
 0x348   :  { %v1333_v37 = vmul.f32 0.3275911, %v1325_v4  ;;  %2720 = vrcp.f32 %v1337_v13  ;;  %v1437_v28 = vsub.f32 0.0, %v1325_v4  ;;  %v1451_v3 = vmul.f32 1.442695, %v1441_v47 }
 0x349   :  { %v1334_v61 = vmul.f32 0.3275911, %v1326_v21  ;;  %2722 = vrcp.f32 %v1338_v43  ;;  %v1438_v50 = vsub.f32 0.0, %v1326_v21  ;;  %v1453_v10 = vmul.f32 1.442695, %v1442_v62 }
 0x34a   :  { %v1341_v29 = vadd.f32 1.0, %v1333_v37  ;;  %v1445_v39 = vmul.f32 %v1437_v28, %v1325_v4  ;;  %v1293_v11 = vmul.f32 0.5, %v3309_v46  ;;  %v1294_v60 = vmul.f32 0.5, %v3313_v40 }
 0x34b   :  { %v1342_v35 = vadd.f32 1.0, %v1334_v61  ;;  %v1446_v56 = vmul.f32 %v1438_v50, %v1326_v21 }
 0x34c   :  { %2724 = vrcp.f32 %v1341_v29  ;;  %v1459_v36 = vmul.f32 1.442695, %v1445_v39 }
 0x34d   :  { %2726 = vrcp.f32 %v1342_v35  ;;  %v1461_v22 = vmul.f32 1.442695, %v1446_v56 }
 0x34e   :  { %2728 = vpow2.f32 %v1451_v3 }
 0x34f   :  { %2730 = vpow2.f32 %v1453_v10 }
 0x350   :  { %2732 = vpow2.f32 %v1459_v36 }
 0x351   :  { %2734 = vpow2.f32 %v1461_v22 }
 0x352   :  { %v2721_v25 = vpop.eup %2720 }
 0x353   :  { %v2723_v49 = vpop.eup %2722  ;;  %v1361_v51 = vmul.f32 1.0614054, %v2721_v25 }
 0x354   :  { %v1362_v52 = vmul.f32 1.0614054, %v2723_v49 }
 0x355   :  { %v1369_v27 = vadd.f32 -1.4531521, %v1361_v51 }
 0x356   :  { %v2725_v33 = vpop.eup %2724  ;;  %v1370_v54 = vadd.f32 -1.4531521, %v1362_v52 }
 0x357   :  { %v2727_v44 = vpop.eup %2726  ;;  %v1365_v12 = vmul.f32 1.0614054, %v2725_v33  ;;  %v1377_v14 = vmul.f32 %v2721_v25, %v1369_v27 }
 0x358   :  { %v1366_v18 = vmul.f32 1.0614054, %v2727_v44  ;;  %v1378_v20 = vmul.f32 %v2723_v49, %v1370_v54  ;;  %v2729_v50 = vpop.eup %2728 }
 0x359   :  { %v1373_v17 = vadd.f32 -1.4531521, %v1365_v12  ;;  %v1385_v26 = vadd.f32 1.4214138, %v1377_v14  ;;  %v2731_v52 = vpop.eup %2730 }
 0x35a   :  { %v1374_v32 = vadd.f32 -1.4531521, %v1366_v18  ;;  %v1386_v42 = vadd.f32 1.4214138, %v1378_v20  ;;  %v2733_v12 = vpop.eup %2732  ;;  %v1313_v20 = vsel %vm1305_vm0, 1.0, %v2793_v34 }
 0x35b   :  { %v1381_v45 = vmul.f32 %v2725_v33, %v1373_v17  ;;  %v1393_v31 = vmul.f32 %v2721_v25, %v1385_v26  ;;  %v1314_v17 = vsel %vm1306_vm1, 1.0, %v2793_v34 }
 0x35c   :  { %v1382_v41 = vmul.f32 %v2727_v44, %v1374_v32  ;;  %v1394_v9 = vmul.f32 %v2723_v49, %v1386_v42 }
 0x35d   :  { %v1389_v53 = vadd.f32 1.4214138, %v1381_v45  ;;  %v1401_v57 = vadd.f32 -0.28449672, %v1393_v31 }
 0x35e   :  { %v1390_v4 = vadd.f32 1.4214138, %v1382_v41  ;;  %v1402_v13 = vadd.f32 -0.28449672, %v1394_v9  ;;  %v1289_v41 = vmul.f32 0.5, %v3294_v48 }
 0x35f   :  { %v1397_v21 = vmul.f32 %v2725_v33, %v1389_v53  ;;  %v1409_v43 = vmul.f32 %v2721_v25, %v1401_v57  ;;  %v1290_v53 = vmul.f32 0.5, %v3298_v38 }
 0x360   :  { %v1398_v37 = vmul.f32 %v2727_v44, %v1390_v4  ;;  %v1410_v61 = vmul.f32 %v2723_v49, %v1402_v13 }
 0x361   :  { %v1405_v29 = vadd.f32 -0.28449672, %v1397_v21  ;;  %v1417_v35 = vadd.f32 0.2548296, %v1409_v43 }
 0x362   :  { %v1406_v23 = vadd.f32 -0.28449672, %v1398_v37  ;;  %v1418_v24 = vadd.f32 0.2548296, %v1410_v61 }
 0x363   :  { %v1413_v28 = vmul.f32 %v2725_v33, %v1405_v29  ;;  %v1425_v47 = vmul.f32 %v2721_v25, %v1417_v35  ;;  %v2735_v25 = vpop.eup %2734 }
 0x364   :  { %v1414_v62 = vmul.f32 %v2727_v44, %v1406_v23  ;;  %v1426_v51 = vmul.f32 %v2723_v49, %v1418_v24 }
 0x365   :  { %v1421_v27 = vadd.f32 0.2548296, %v1413_v28  ;;  %v1465_v54 = vmul.f32 %v2729_v50, %v1425_v47  ;;  %v1678_v47 = vld [vmem:[%s3603_s15 + $0x8] sm:$0xff] }
 0x366   :  { %v1422_v39 = vadd.f32 0.2548296, %v1414_v62  ;;  %v1466_v3 = vmul.f32 %v2731_v52, %v1426_v51 }
 0x367   :  { %v1429_v56 = vmul.f32 %v2725_v33, %v1421_v27  ;;  %v1473_v10 = vsub.f32 1.0, %v1465_v54  ;;  %v1317_v33 = vsel %vm1309_vm3, 1.0, %v2793_v34 }
 0x368   :  { %v1430_v14 = vmul.f32 %v2727_v44, %v1422_v39  ;;  %v1474_v18 = vsub.f32 1.0, %v1466_v3  ;;  %v1318_v44 = vsel %vm1310_vm4, 1.0, %v2793_v34 }
 0x369   :  { %v1469_v49 = vmul.f32 %v2733_v12, %v1429_v56  ;;  %v1481_v16 = vmul.f32 %v1473_v10, %v1313_v20 }
 0x36a   :  { %v1470_v26 = vmul.f32 %v2735_v25, %v1430_v14  ;;  %v1482_v59 = vmul.f32 %v1474_v18, %v1314_v17 }
 0x36b   :  { %v1477_v32 = vsub.f32 1.0, %v1469_v49  ;;  %v1489_v22 = vadd.f32 1.0, %v1481_v16 }
 0x36c   :  { %v1478_v42 = vsub.f32 1.0, %v1470_v26  ;;  %v1490_v31 = vadd.f32 1.0, %v1482_v59 }
 0x36d   :  { %v1485_v36 = vmul.f32 %v1477_v32, %v1317_v33  ;;  %v1497_v4 = vmul.f32 %v1489_v22, %v1289_v41 }
 0x36e   :  { %v1486_v45 = vmul.f32 %v1478_v42, %v1318_v44  ;;  %v1498_v21 = vmul.f32 %v1490_v31, %v1290_v53 }
 0x36f   :  { %v1493_v9 = vadd.f32 1.0, %v1485_v36 }
 0x370   :  { %v1494_v57 = vadd.f32 1.0, %v1486_v45 }
 0x371   :  { %v1501_v13 = vmul.f32 %v1493_v9, %v1293_v11 }
 0x372   :  { %v1502_v43 = vmul.f32 %v1494_v57, %v1294_v60 }
 0x373   :  { %v2629_v37 = vpack.c.bf16 %v1501_v13, %v1497_v4 }
 0x374   :  { %v2627_v61 = vpack.c.bf16 %v1502_v43, %v1498_v21 }
 0x376   :  { %2628 = vmatprep.subr.bf16.mxu1 %v2627_v61 }
 0x377   :  { %2630 = vmatpush1.bf16.msra.mxu1 %v2629_v37 }
 0x37a   :  { %2565 = vmatmul.mubr.msk.f32.vlgmr.msra.gmra.mrb[14].mxu1 %vm589_vm2, %v3275_v19 }
 0x37b   :  { %1670 = vmatprep.mubr.f32.mxu1 %v2785_v30 }
 0x37e   :  { %2566 = vmatmul.mubr.msk.f32.gmra.mrb[16].mxu1 %vm589_vm2, %v3283_v1  ;;  %v1677_v1 = vld [vmem:[%s3603_s15] sm:$0xff] }
 0x37f   :  { %1826 = vmatprep.mubr.f32.mxu1 %v2785_v30 }
 0x3d2   :  { %v1589_v48 = vpop.f32.mrb[14].mxu0 }
 0x3d3   :  { %v1591_v38 = vpop.f32.mrb[15].mxu0  ;;  %v1590_v24 = vadd.f32 %v1589_v48, %v3160_v55 }
 0x3d4   :  { %v1592_v35 = vadd.f32 %v1591_v38, %v3160_v55 }
 0x3d6   :  { %v1595_v46 = vpop.f32.mrb[16].mxu0 }
 0x3d7   :  { %v1596_v40 = vadd.f32 %v1595_v46, %v3170_v2  ;;  %v1597_v29 = vpop.f32.mrb[17].mxu0 }
 0x3d8   :  { %v1598_v23 = vadd.f32 %v1597_v29, %v3170_v2 }
 0x3d9   :  { %v2633_v28 = vpack.c.bf16 %v1596_v40, %v1590_v24 }
 0x3da   :  { %v2631_v19 = vpack.c.bf16 %v1598_v23, %v1592_v35 }
 0x3dc   :  { %2632 = vmatprep.subr.bf16.mxu0 %v2631_v19 }
 0x3dd   :  { %2634 = vmatpush1.bf16.msra.mxu0 %v2633_v28 }
 0x3e0   :  { %2567 = vmatmul.mubr.msk.f32.vlgmr.msra.gmra.mrb[18].mxu0 %vm589_vm2, %v1677_v1 }
 0x3e1   :  { %1755 = vmatprep.mubr.f32.mxu0 %v2785_v30 }
 0x3e4   :  { %2568 = vmatmul.mubr.msk.f32.gmra.mrb[20].mxu0 %vm589_vm2, %v1678_v47 }
 0x3e5   :  { %1919 = vmatprep.mubr.f32.mxu0 %v2785_v30 }
 0x44d   :  { %v1666_v50 = vpop.f32.mrb[14].mxu1 }
 0x44e   :  { %v1668_v62 = vpop.f32.mrb[15].mxu1  ;;  %v1667_v3 = vadd.f32 %v1666_v50, %v3160_v55 }
 0x44f   :  { %v1669_v54 = vadd.f32 %v1668_v62, %v3160_v55 }
 0x451   :  { %v1672_v51 = vpop.f32.mrb[16].mxu1 }
 0x452   :  { %v1673_v52 = vadd.f32 %v1672_v51, %v3170_v2  ;;  %v1674_v27 = vpop.f32.mrb[17].mxu1 }
 0x453   :  { %v1675_v39 = vadd.f32 %v1674_v27, %v3170_v2 }
 0x454   :  { %v2637_v10 = vpack.c.bf16 %v1673_v52, %v1667_v3 }
 0x455   :  { %v2635_v56 = vpack.c.bf16 %v1675_v39, %v1669_v54 }
 0x457   :  { %2636 = vmatprep.subr.bf16.mxu1 %v2635_v56 }
 0x458   :  { %2638 = vmatpush1.bf16.msra.mxu1 %v2637_v10 }
 0x45b   :  { %2569 = vmatmul.mubr.msk.f32.vlgmr.msra.gmra.mrb[18].mxu1 %vm589_vm2, %v1677_v1 }
 0x45c   :  { %1832 = vmatprep.mubr.f32.mxu1 %v2785_v30 }
 0x45f   :  { %2570 = vmatmul.mubr.msk.f32.gmra.mrb[20].mxu1 %vm589_vm2, %v1678_v47 }
 0x460   :  { %1996 = vmatprep.mubr.f32.mxu1 %v2785_v30 }
 0x4b3   :  { %v1751_v12 = vpop.f32.mrb[18].mxu0 }
 0x4b4   :  { %v1753_v14 = vpop.f32.mrb[19].mxu0  ;;  %v1839_v25 = vsub.f32 %v1590_v24, %v1751_v12 }
 0x4b5   :  { %v1840_v18 = vsub.f32 %v1592_v35, %v1753_v14 }
 0x4b6   :  { %v1847_v59 = vmul.f32 %v1839_v25, %v1839_v25 }
 0x4b7   :  { %v1757_v20 = vpop.f32.mrb[20].mxu0  ;;  %v1848_v16 = vmul.f32 %v1840_v18, %v1840_v18 }
 0x4b8   :  { %v1843_v2 = vsub.f32 %v1596_v40, %v1757_v20  ;;  %v1759_v17 = vpop.f32.mrb[21].mxu0 }
 0x4b9   :  { %v1844_v55 = vsub.f32 %v1598_v23, %v1759_v17 }
 0x4ba   :  { %v1851_v49 = vmul.f32 %v1843_v2, %v1843_v2 }
 0x4bb   :  { %v1852_v26 = vmul.f32 %v1844_v55, %v1844_v55 }
 0x4bc   :  { %v2641_v42 = vpack.c.bf16 %v1851_v49, %v1847_v59 }
 0x4bd   :  { %v2639_v32 = vpack.c.bf16 %v1852_v26, %v1848_v16 }
 0x4bf   :  { %2640 = vmatprep.subr.bf16.mxu0 %v2639_v32 }
 0x4c0   :  { %2642 = vmatpush1.bf16.msra.mxu0 %v2641_v42 }
 0x4c3   :  { %2571 = vmatmul.mubr.msk.f32.vlgmr.msra.gmra.mrb[22].mxu0 %vm589_vm2, %v1677_v1 }
 0x4c4   :  { %1925 = vmatprep.mubr.f32.mxu0 %v2785_v30 }
 0x4c7   :  { %2572 = vmatmul.mubr.msk.f32.gmra.mrb[24].mxu0 %vm589_vm2, %v1678_v47 }
 0x4c8   :  { %2385 = vmatprep.mubr.f32.mxu0 %v2785_v30 }
 0x52e   :  { %v1828_v33 = vpop.f32.mrb[18].mxu1 }
 0x52f   :  { %v1830_v44 = vpop.f32.mrb[19].mxu1  ;;  %v3370_v45 = vsub.f32 %v1667_v3, %v1828_v33 }
 0x530   :  { %v3368_v36 = vsub.f32 %v1669_v54, %v1830_v44 }
 0x531   :  { %v1849_v57 = vmul.f32 %v3370_v45, %v3370_v45 }
 0x532   :  { %v1834_v22 = vpop.f32.mrb[20].mxu1  ;;  %v1850_v53 = vmul.f32 %v3368_v36, %v3368_v36 }
 0x533   :  { %v3372_v31 = vsub.f32 %v1673_v52, %v1834_v22  ;;  %v1836_v41 = vpop.f32.mrb[21].mxu1 }
 0x534   :  { %v3374_v11 = vsub.f32 %v1675_v39, %v1836_v41 }
 0x535   :  { %v1853_v9 = vmul.f32 %v3372_v31, %v3372_v31 }
 0x536   :  { %v1854_v60 = vmul.f32 %v3374_v11, %v3374_v11 }
 0x537   :  { %v2645_v13 = vpack.c.bf16 %v1853_v9, %v1849_v57 }
 0x538   :  { %v2643_v4 = vpack.c.bf16 %v1854_v60, %v1850_v53 }
 0x53a   :  { %2644 = vmatprep.subr.bf16.mxu1 %v2643_v4 }
 0x53b   :  { %2646 = vmatpush1.bf16.msra.mxu1 %v2645_v13 }
 0x53e   :  { %2573 = vmatmul.mubr.msk.f32.vlgmr.msra.gmra.mrb[22].mxu1 %vm589_vm2, %v1677_v1 }
 0x53f   :  { %2002 = vmatprep.mubr.f32.mxu1 %v2785_v30 }
 0x542   :  { %2574 = vmatmul.mubr.msk.f32.gmra.mrb[24].mxu1 %vm589_vm2, %v1678_v47 }
 0x543   :  { %2474 = vmatprep.mubr.f32.mxu1 %v2785_v30 }
 0x596   :  { %v1921_v21 = vpop.f32.mrb[22].mxu0 }
 0x597   :  { %v1922_v43 = vadd.f32 1e-06, %v1921_v21  ;;  %v1923_v37 = vpop.f32.mrb[23].mxu0 }
 0x598   :  { %v1924_v61 = vadd.f32 1e-06, %v1923_v37 }
 0x599   :  { %2736 = vrsqrt.f32 %v1922_v43 }
 0x59a   :  { %2738 = vrsqrt.f32 %v1924_v61  ;;  %v1927_v48 = vpop.f32.mrb[24].mxu0 }
 0x59b   :  { %v1928_v38 = vadd.f32 1e-06, %v1927_v48  ;;  %v1929_v46 = vpop.f32.mrb[25].mxu0 }
 0x59c   :  { %v1930_v40 = vadd.f32 1e-06, %v1929_v46 }
 0x59d   :  { %2740 = vrsqrt.f32 %v1928_v38 }
 0x59e   :  { %2742 = vrsqrt.f32 %v1930_v40 }
 0x5a3   :  { %v2737_v29 = vpop.eup %2736 }
 0x5a4   :  { %v2739_v35 = vpop.eup %2738  ;;  %v2017_v23 = vmul.f32 %v2737_v29, %v1839_v25 }
 0x5a5   :  { %v2018_v24 = vmul.f32 %v2739_v35, %v1840_v18 }
 0x5a6   :  { %v2037_v19 = vmul.f32 %v3164_v58, %v2017_v23 }
 0x5a7   :  { %v2741_v28 = vpop.eup %2740  ;;  %v2038_v1 = vmul.f32 %v3164_v58, %v2018_v24 }
 0x5a8   :  { %v2743_v47 = vpop.eup %2742  ;;  %v2021_v50 = vmul.f32 %v2741_v28, %v1843_v2  ;;  %v3391_v62 = vadd.f32 %v3168_v0, %v2037_v19 }
 0x5a9   :  { %v2022_v51 = vmul.f32 %v2743_v47, %v1844_v55  ;;  %v3394_v52 = vadd.f32 %v3168_v0, %v2038_v1 }
 0x5aa   :  { %v2041_v27 = vmul.f32 %v3172_v5, %v2021_v50  ;;  %v3398_v54 = vmul.f32 0.70710677, %v3391_v62 }
 0x5ab   :  { %v2042_v39 = vmul.f32 %v3172_v5, %v2022_v51  ;;  %v3402_v3 = vmul.f32 0.70710677, %v3394_v52 }
 0x5ac   :  { %v3405_v56 = vadd.f32 %v3176_v7, %v2041_v27  ;;  %v2097_v10 = vand.u32 2147483647, %v3398_v54  ;;  %vm2081_vm5 = vcmp.ge.f32.partialorder %v3398_v54, 0.0 }
 0x5ad   :  { %v3409_v12 = vadd.f32 %v3176_v7, %v2042_v39  ;;  %v2098_v14 = vand.u32 2147483647, %v3402_v3  ;;  %vm2082_vm6 = vcmp.ge.f32.partialorder %v3402_v3, 0.0 }
 0x5ae   :  { %v3413_v18 = vmul.f32 0.70710677, %v3405_v56  ;;  %v2105_v20 = vmul.f32 0.3275911, %v2097_v10  ;;  %v2209_v33 = vsub.f32 0.0, %v2097_v10 }
 0x5af   :  { %v3416_v25 = vmul.f32 0.70710677, %v3409_v12  ;;  %v2106_v2 = vmul.f32 0.3275911, %v2098_v14  ;;  %v2210_v44 = vsub.f32 0.0, %v2098_v14 }
 0x5b0   :  { %v2101_v17 = vand.u32 2147483647, %v3413_v18  ;;  %v2113_v55 = vadd.f32 1.0, %v2105_v20  ;;  %v2217_v9 = vmul.f32 %v2209_v33, %v2097_v10  ;;  %vm2085_vm7 = vcmp.ge.f32.partialorder %v3413_v18, 0.0 }
 0x5b1   :  { %v2102_v49 = vand.u32 2147483647, %v3416_v25  ;;  %v2114_v16 = vadd.f32 1.0, %v2106_v2  ;;  %v2218_v57 = vmul.f32 %v2210_v44, %v2098_v14  ;;  %vm2086_vm8 = vcmp.ge.f32.partialorder %v3416_v25, 0.0 }
 0x5b2   :  { %v2109_v26 = vmul.f32 0.3275911, %v2101_v17  ;;  %2744 = vrcp.f32 %v2113_v55  ;;  %v2213_v41 = vsub.f32 0.0, %v2101_v17  ;;  %v2225_v48 = vmul.f32 1.442695, %v2217_v9 }
 0x5b3   :  { %v2110_v59 = vmul.f32 0.3275911, %v2102_v49  ;;  %2746 = vrcp.f32 %v2114_v16  ;;  %v2214_v60 = vsub.f32 0.0, %v2102_v49  ;;  %v2227_v40 = vmul.f32 1.442695, %v2218_v57 }
 0x5b4   :  { %v2117_v32 = vadd.f32 1.0, %v2109_v26  ;;  %v2221_v61 = vmul.f32 %v2213_v41, %v2101_v17  ;;  %v2069_v18 = vmul.f32 0.5, %v3405_v56  ;;  %v2070_v25 = vmul.f32 0.5, %v3409_v12  ;;  %v3451_v56 = vld [vmem:[%s3604_s16 + $0x10] sm:$0xff]  ;;  %v3459_v12 = vld [vmem:[%s3604_s16 + $0x18] sm:$0xff] }
 0x5b5   :  { %v2118_v42 = vadd.f32 1.0, %v2110_v59  ;;  %v2222_v46 = vmul.f32 %v2214_v60, %v2102_v49 }
 0x5b6   :  { %2748 = vrcp.f32 %v2117_v32  ;;  %v2233_v50 = vmul.f32 1.442695, %v2221_v61 }
 0x5b7   :  { %2750 = vrcp.f32 %v2118_v42  ;;  %v2235_v51 = vmul.f32 1.442695, %v2222_v46 }
 0x5b8   :  { %2752 = vpow2.f32 %v2225_v48 }
 0x5b9   :  { %2754 = vpow2.f32 %v2227_v40 }
 0x5ba   :  { %2756 = vpow2.f32 %v2233_v50 }
 0x5bb   :  { %2758 = vpow2.f32 %v2235_v51 }
 0x5bc   :  { %v2745_v22 = vpop.eup %2744 }
 0x5bd   :  { %v2747_v53 = vpop.eup %2746  ;;  %v2137_v4 = vmul.f32 1.0614054, %v2745_v22 }
 0x5be   :  { %v2138_v13 = vmul.f32 1.0614054, %v2747_v53 }
 0x5bf   :  { %v2145_v21 = vadd.f32 -1.4531521, %v2137_v4 }
 0x5c0   :  { %v2749_v43 = vpop.eup %2748  ;;  %v2146_v37 = vadd.f32 -1.4531521, %v2138_v13 }
 0x5c1   :  { %v2751_v38 = vpop.eup %2750  ;;  %v2141_v29 = vmul.f32 1.0614054, %v2749_v43  ;;  %v2153_v35 = vmul.f32 %v2745_v22, %v2145_v21 }
 0x5c2   :  { %v2142_v23 = vmul.f32 1.0614054, %v2751_v38  ;;  %v2154_v24 = vmul.f32 %v2747_v53, %v2146_v37  ;;  %v2753_v60 = vpop.eup %2752 }
 0x5c3   :  { %v2149_v19 = vadd.f32 -1.4531521, %v2141_v29  ;;  %v2161_v28 = vadd.f32 1.4214138, %v2153_v35  ;;  %v2755_v13 = vpop.eup %2754 }
 0x5c4   :  { %v2150_v1 = vadd.f32 -1.4531521, %v2142_v23  ;;  %v2162_v47 = vadd.f32 1.4214138, %v2154_v24  ;;  %v2757_v29 = vpop.eup %2756  ;;  %v2089_v24 = vsel %vm2081_vm5, 1.0, %v2793_v34 }
 0x5c5   :  { %v2157_v27 = vmul.f32 %v2749_v43, %v2149_v19  ;;  %v2169_v39 = vmul.f32 %v2745_v22, %v2161_v28  ;;  %v2090_v19 = vsel %vm2082_vm6, 1.0, %v2793_v34 }
 0x5c6   :  { %v2158_v10 = vmul.f32 %v2751_v38, %v2150_v1  ;;  %v2170_v14 = vmul.f32 %v2747_v53, %v2162_v47 }
 0x5c7   :  { %v2165_v20 = vadd.f32 1.4214138, %v2157_v27  ;;  %v2177_v2 = vadd.f32 -0.28449672, %v2169_v39 }
 0x5c8   :  { %v2166_v17 = vadd.f32 1.4214138, %v2158_v10  ;;  %v2178_v55 = vadd.f32 -0.28449672, %v2170_v14  ;;  %v2065_v10 = vmul.f32 0.5, %v3391_v62  ;;  %v3435_v62 = vld [vmem:[%s3604_s16] sm:$0xff] }
 0x5c9   :  { %v2173_v49 = vmul.f32 %v2749_v43, %v2165_v20  ;;  %v2185_v16 = vmul.f32 %v2745_v22, %v2177_v2  ;;  %v2066_v20 = vmul.f32 0.5, %v3394_v52  ;;  %v3443_v52 = vld [vmem:[%s3604_s16 + $0x8] sm:$0xff] }
 0x5ca   :  { %v2174_v26 = vmul.f32 %v2751_v38, %v2166_v17  ;;  %v2186_v59 = vmul.f32 %v2747_v53, %v2178_v55 }
 0x5cb   :  { %v2181_v32 = vadd.f32 -0.28449672, %v2173_v49  ;;  %v2193_v42 = vadd.f32 0.2548296, %v2185_v16 }
 0x5cc   :  { %v2182_v33 = vadd.f32 -0.28449672, %v2174_v26  ;;  %v2194_v44 = vadd.f32 0.2548296, %v2186_v59 }
 0x5cd   :  { %v2189_v41 = vmul.f32 %v2749_v43, %v2181_v32  ;;  %v2201_v9 = vmul.f32 %v2745_v22, %v2193_v42  ;;  %v2759_v22 = vpop.eup %2758 }
 0x5ce   :  { %v2190_v57 = vmul.f32 %v2751_v38, %v2182_v33  ;;  %v2202_v4 = vmul.f32 %v2747_v53, %v2194_v44 }
 0x5cf   :  { %v2197_v21 = vadd.f32 0.2548296, %v2189_v41  ;;  %v2241_v37 = vmul.f32 %v2753_v60, %v2201_v9 }
 0x5d0   :  { %v2198_v61 = vadd.f32 0.2548296, %v2190_v57  ;;  %v2242_v48 = vmul.f32 %v2755_v13, %v2202_v4 }
 0x5d1   :  { %v2205_v46 = vmul.f32 %v2749_v43, %v2197_v21  ;;  %v2249_v40 = vsub.f32 1.0, %v2241_v37  ;;  %v2093_v43 = vsel %vm2085_vm7, 1.0, %v2793_v34 }
 0x5d2   :  { %v2206_v35 = vmul.f32 %v2751_v38, %v2198_v61  ;;  %v2250_v23 = vsub.f32 1.0, %v2242_v48  ;;  %v2094_v38 = vsel %vm2086_vm8, 1.0, %v2793_v34 }
 0x5d3   :  { %v2245_v53 = vmul.f32 %v2757_v29, %v2205_v46  ;;  %v2257_v54 = vmul.f32 %v2249_v40, %v2089_v24 }
 0x5d4   :  { %v2246_v28 = vmul.f32 %v2759_v22, %v2206_v35  ;;  %v2258_v3 = vmul.f32 %v2250_v23, %v2090_v19 }
 0x5d5   :  { %v2253_v1 = vsub.f32 1.0, %v2245_v53  ;;  %v2265_v51 = vadd.f32 1.0, %v2257_v54 }
 0x5d6   :  { %v2254_v47 = vsub.f32 1.0, %v2246_v28  ;;  %v2266_v39 = vadd.f32 1.0, %v2258_v3 }
 0x5d7   :  { %v2261_v50 = vmul.f32 %v2253_v1, %v2093_v43  ;;  %v2273_v17 = vmul.f32 %v2265_v51, %v2065_v10 }
 0x5d8   :  { %v2262_v27 = vmul.f32 %v2254_v47, %v2094_v38  ;;  %v2274_v49 = vmul.f32 %v2266_v39, %v2066_v20 }
 0x5d9   :  { %v2269_v14 = vadd.f32 1.0, %v2261_v50 }
 0x5da   :  { %v2270_v2 = vadd.f32 1.0, %v2262_v27 }
 0x5db   :  { %v2277_v55 = vmul.f32 %v2269_v14, %v2069_v18 }
 0x5dc   :  { %v2278_v16 = vmul.f32 %v2270_v2, %v2070_v25 }
 0x5dd   :  { %v2649_v26 = vpack.c.bf16 %v2277_v55, %v2273_v17 }
 0x5de   :  { %v2647_v59 = vpack.c.bf16 %v2278_v16, %v2274_v49 }
 0x5e0   :  { %2648 = vmatprep.subr.bf16.mxu0 %v2647_v59 }
 0x5e1   :  { %2650 = vmatpush1.bf16.msra.mxu0 %v2649_v26 }
 0x5e4   :  { %2575 = vmatmul.mubr.msk.f32.vlgmr.msra.gmra.mrb[26].mxu0 %vm589_vm2, %v3435_v62 }
 0x5e5   :  { %2391 = vmatprep.mubr.f32.mxu0 %v2785_v30 }
 0x5e8   :  { %2576 = vmatmul.mubr.msk.f32.gmra.mrb[28].mxu0 %vm589_vm2, %v3443_v52 }
 0x5e9   :  { %2397 = vmatprep.mubr.f32.mxu0 %v2785_v30 }
 0x5ec   :  { %2577 = vmatmul.mubr.msk.f32.gmra.mrb[30].mxu0 %vm589_vm2, %v3451_v56 }
 0x5ed   :  { %2403 = vmatprep.mubr.f32.mxu0 %v2785_v30 }
 0x5f0   :  { %2578 = vmatmul.mubr.msk.f32.gmra.mrb[32].mxu0 %vm589_vm2, %v3459_v12 }
 0x611   :  { %v1998_v32 = vpop.f32.mrb[22].mxu1 }
 0x612   :  { %v1999_v42 = vadd.f32 1e-06, %v1998_v32  ;;  %v2000_v33 = vpop.f32.mrb[23].mxu1 }
 0x613   :  { %v2001_v44 = vadd.f32 1e-06, %v2000_v33 }
 0x614   :  { %2760 = vrsqrt.f32 %v1999_v42 }
 0x615   :  { %2762 = vrsqrt.f32 %v2001_v44  ;;  %v2004_v41 = vpop.f32.mrb[24].mxu1 }
 0x616   :  { %v2005_v9 = vadd.f32 1e-06, %v2004_v41  ;;  %v2006_v60 = vpop.f32.mrb[25].mxu1 }
 0x617   :  { %v2007_v57 = vadd.f32 1e-06, %v2006_v60 }
 0x618   :  { %2764 = vrsqrt.f32 %v2005_v9 }
 0x619   :  { %2766 = vrsqrt.f32 %v2007_v57 }
 0x61e   :  { %v2761_v4 = vpop.eup %2760 }
 0x61f   :  { %v2763_v13 = vpop.eup %2762  ;;  %v2019_v21 = vmul.f32 %v2761_v4, %v3370_v45 }
 0x620   :  { %v2020_v37 = vmul.f32 %v2763_v13, %v3368_v36 }
 0x621   :  { %v2039_v61 = vmul.f32 %v3164_v58, %v2019_v21 }
 0x622   :  { %v2765_v48 = vpop.eup %2764  ;;  %v2040_v46 = vmul.f32 %v3164_v58, %v2020_v37 }
 0x623   :  { %v2767_v40 = vpop.eup %2766  ;;  %v2023_v29 = vmul.f32 %v2765_v48, %v3372_v31  ;;  %v3469_v35 = vadd.f32 %v3168_v0, %v2039_v61 }
 0x624   :  { %v2024_v23 = vmul.f32 %v2767_v40, %v3374_v11  ;;  %v3473_v24 = vadd.f32 %v3168_v0, %v2040_v46 }
 0x625   :  { %v2043_v45 = vmul.f32 %v3172_v5, %v2023_v29  ;;  %v3477_v36 = vmul.f32 0.70710677, %v3469_v35 }
 0x626   :  { %v2044_v22 = vmul.f32 %v3172_v5, %v2024_v23  ;;  %v3481_v58 = vmul.f32 0.70710677, %v3473_v24 }
 0x627   :  { %v3484_v31 = vadd.f32 %v3176_v7, %v2043_v45  ;;  %v2099_v19 = vand.u32 2147483647, %v3477_v36  ;;  %vm2083_vm9 = vcmp.ge.f32.partialorder %v3477_v36, 0.0 }
 0x628   :  { %v3488_v11 = vadd.f32 %v3176_v7, %v2044_v22  ;;  %v2100_v0 = vand.u32 2147483647, %v3481_v58  ;;  %vm2084_vm10 = vcmp.ge.f32.partialorder %v3481_v58, 0.0 }
 0x629   :  { %v3492_v53 = vmul.f32 0.70710677, %v3484_v31  ;;  %v2107_v54 = vmul.f32 0.3275911, %v2099_v19  ;;  %v2211_v27 = vsub.f32 0.0, %v2099_v19 }
 0x62a   :  { %v3495_v28 = vmul.f32 0.70710677, %v3488_v11  ;;  %v2108_v5 = vmul.f32 0.3275911, %v2100_v0  ;;  %v2212_v39 = vsub.f32 0.0, %v2100_v0 }
 0x62b   :  { %v2103_v3 = vand.u32 2147483647, %v3492_v53  ;;  %v2115_v1 = vadd.f32 1.0, %v2107_v54  ;;  %v2219_v14 = vmul.f32 %v2211_v27, %v2099_v19  ;;  %vm2087_vm11 = vcmp.ge.f32.partialorder %v3492_v53, 0.0 }
 0x62c   :  { %v2104_v47 = vand.u32 2147483647, %v3495_v28  ;;  %v2116_v43 = vadd.f32 1.0, %v2108_v5  ;;  %v2220_v2 = vmul.f32 %v2212_v39, %v2100_v0  ;;  %vm2088_vm12 = vcmp.ge.f32.partialorder %v3495_v28, 0.0 }
 0x62d   :  { %v2111_v38 = vmul.f32 0.3275911, %v2103_v3  ;;  %2768 = vrcp.f32 %v2115_v1  ;;  %v2215_v18 = vsub.f32 0.0, %v2103_v3  ;;  %v2229_v32 = vmul.f32 1.442695, %v2219_v14 }
 0x62e   :  { %v2112_v7 = vmul.f32 0.3275911, %v2104_v47  ;;  %2770 = vrcp.f32 %v2116_v43  ;;  %v2216_v25 = vsub.f32 0.0, %v2104_v47  ;;  %v2231_v44 = vmul.f32 1.442695, %v2220_v2 }
 0x62f   :  { %v2119_v50 = vadd.f32 1.0, %v2111_v38  ;;  %v2223_v59 = vmul.f32 %v2215_v18, %v2103_v3  ;;  %v2071_v53 = vmul.f32 0.5, %v3484_v31  ;;  %v2072_v28 = vmul.f32 0.5, %v3488_v11 }
 0x630   :  { %v2120_v51 = vadd.f32 1.0, %v2112_v7  ;;  %v2224_v33 = vmul.f32 %v2216_v25, %v2104_v47 }
 0x631   :  { %2772 = vrcp.f32 %v2119_v50  ;;  %v2237_v61 = vmul.f32 1.442695, %v2223_v59 }
 0x632   :  { %2774 = vrcp.f32 %v2120_v51  ;;  %v2239_v48 = vmul.f32 1.442695, %v2224_v33 }
 0x633   :  { %2776 = vpow2.f32 %v2229_v32 }
 0x634   :  { %2778 = vpow2.f32 %v2231_v44  ;;  %v2091_v44 = vsel %vm2083_vm9, 1.0, %v2793_v34 }
 0x635   :  { %2780 = vpow2.f32 %v2237_v61  ;;  %v2067_v61 = vmul.f32 0.5, %v3469_v35 }
 0x636   :  { %2782 = vpow2.f32 %v2239_v48 }
 0x637   :  { %v2769_v10 = vpop.eup %2768 }
 0x638   :  { %v2771_v20 = vpop.eup %2770  ;;  %v2139_v17 = vmul.f32 1.0614054, %v2769_v10 }
 0x639   :  { %v2140_v55 = vmul.f32 1.0614054, %v2771_v20 }
 0x63a   :  { %v2147_v49 = vadd.f32 -1.4531521, %v2139_v17 }
 0x63b   :  { %v2773_v16 = vpop.eup %2772  ;;  %v2148_v26 = vadd.f32 -1.4531521, %v2140_v55 }
 0x63c   :  { %v2775_v42 = vpop.eup %2774  ;;  %v2143_v41 = vmul.f32 1.0614054, %v2773_v16  ;;  %v2155_v9 = vmul.f32 %v2769_v10, %v2147_v49 }
 0x63d   :  { %v2144_v60 = vmul.f32 1.0614054, %v2775_v42  ;;  %v2156_v57 = vmul.f32 %v2771_v20, %v2148_v26  ;;  %v2777_v27 = vpop.eup %2776 }
 0x63e   :  { %v2151_v4 = vadd.f32 -1.4531521, %v2143_v41  ;;  %v2163_v13 = vadd.f32 1.4214138, %v2155_v9  ;;  %v2779_v14 = vpop.eup %2778  ;;  %v2092_v41 = vsel %vm2084_vm10, 1.0, %v2793_v34 }
 0x63f   :  { %v2152_v21 = vadd.f32 -1.4531521, %v2144_v60  ;;  %v2164_v37 = vadd.f32 1.4214138, %v2156_v57  ;;  %v2781_v59 = vpop.eup %2780 }
 0x640   :  { %v2159_v46 = vmul.f32 %v2773_v16, %v2151_v4  ;;  %v2171_v40 = vmul.f32 %v2769_v10, %v2163_v13 }
 0x641   :  { %v2160_v29 = vmul.f32 %v2775_v42, %v2152_v21  ;;  %v2172_v23 = vmul.f32 %v2771_v20, %v2164_v37 }
 0x642   :  { %v2167_v45 = vadd.f32 1.4214138, %v2159_v46  ;;  %v2179_v22 = vadd.f32 -0.28449672, %v2171_v40  ;;  %v2068_v46 = vmul.f32 0.5, %v3473_v24 }
 0x643   :  { %v2168_v19 = vadd.f32 1.4214138, %v2160_v29  ;;  %v2180_v0 = vadd.f32 -0.28449672, %v2172_v23 }
 0x644   :  { %v2175_v54 = vmul.f32 %v2773_v16, %v2167_v45  ;;  %v2187_v5 = vmul.f32 %v2769_v10, %v2179_v22 }
 0x645   :  { %v2176_v3 = vmul.f32 %v2775_v42, %v2168_v19  ;;  %v2188_v1 = vmul.f32 %v2771_v20, %v2180_v0 }
 0x646   :  { %v2183_v47 = vadd.f32 -0.28449672, %v2175_v54  ;;  %v2195_v43 = vadd.f32 0.2548296, %v2187_v5 }
 0x647   :  { %v2184_v38 = vadd.f32 -0.28449672, %v2176_v3  ;;  %v2196_v7 = vadd.f32 0.2548296, %v2188_v1 }
 0x648   :  { %v2191_v50 = vmul.f32 %v2773_v16, %v2183_v47  ;;  %v2203_v51 = vmul.f32 %v2769_v10, %v2195_v43  ;;  %v2783_v10 = vpop.eup %2782 }
 0x649   :  { %v2192_v39 = vmul.f32 %v2775_v42, %v2184_v38  ;;  %v2204_v18 = vmul.f32 %v2771_v20, %v2196_v7 }
 0x64a   :  { %v2199_v25 = vadd.f32 0.2548296, %v2191_v50  ;;  %v2243_v2 = vmul.f32 %v2777_v27, %v2203_v51 }
 0x64b   :  { %v2200_v17 = vadd.f32 0.2548296, %v2192_v39  ;;  %v2244_v55 = vmul.f32 %v2779_v14, %v2204_v18 }
 0x64c   :  { %v2207_v49 = vmul.f32 %v2773_v16, %v2199_v25  ;;  %v2251_v26 = vsub.f32 1.0, %v2243_v2  ;;  %v2095_v16 = vsel %vm2087_vm11, 1.0, %v2793_v34 }
 0x64d   :  { %v2208_v32 = vmul.f32 %v2775_v42, %v2200_v17  ;;  %v2252_v33 = vsub.f32 1.0, %v2244_v55  ;;  %v2096_v42 = vsel %vm2088_vm12, 1.0, %v2793_v34 }
 0x64e   :  { %v2247_v20 = vmul.f32 %v2781_v59, %v2207_v49  ;;  %v2259_v36 = vmul.f32 %v2251_v26, %v2091_v44 }
 0x64f   :  { %v2248_v9 = vmul.f32 %v2783_v10, %v2208_v32  ;;  %v2260_v58 = vmul.f32 %v2252_v33, %v2092_v41 }
 0x650   :  { %v2255_v60 = vsub.f32 1.0, %v2247_v20  ;;  %v2267_v13 = vadd.f32 1.0, %v2259_v36 }
 0x651   :  { %v2256_v57 = vsub.f32 1.0, %v2248_v9  ;;  %v2268_v37 = vadd.f32 1.0, %v2260_v58 }
 0x652   :  { %v2263_v4 = vmul.f32 %v2255_v60, %v2095_v16  ;;  %v2275_v29 = vmul.f32 %v2267_v13, %v2067_v61 }
 0x653   :  { %v2264_v21 = vmul.f32 %v2256_v57, %v2096_v42  ;;  %v2276_v45 = vmul.f32 %v2268_v37, %v2068_v46 }
 0x654   :  { %v2271_v48 = vadd.f32 1.0, %v2263_v4 }
 0x655   :  { %v2272_v40 = vadd.f32 1.0, %v2264_v21 }
 0x656   :  { %v2279_v23 = vmul.f32 %v2271_v48, %v2071_v53 }
 0x657   :  { %v2280_v22 = vmul.f32 %v2272_v40, %v2072_v28 }
 0x658   :  { %v2653_v19 = vpack.c.bf16 %v2279_v23, %v2275_v29 }
 0x659   :  { %v2651_v34 = vpack.c.bf16 %v2280_v22, %v2276_v45 }
 0x65b   :  { %2652 = vmatprep.subr.bf16.mxu1 %v2651_v34 }
 0x65c   :  { %2654 = vmatpush1.bf16.msra.mxu1 %v2653_v19 }
 0x65f   :  { %2579 = vmatmul.mubr.msk.f32.vlgmr.msra.gmra.mrb[26].mxu1 %vm589_vm2, %v3435_v62 }
 0x660   :  { %2480 = vmatprep.mubr.f32.mxu1 %v2785_v30 }
 0x663   :  { %2580 = vmatmul.mubr.msk.f32.gmra.mrb[28].mxu1 %vm589_vm2, %v3443_v52 }
 0x664   :  { %2486 = vmatprep.mubr.f32.mxu1 %v2785_v30 }
 0x667   :  { %2581 = vmatmul.mubr.msk.f32.gmra.mrb[30].mxu1 %vm589_vm2, %v3451_v56 }
 0x668   :  { %2492 = vmatprep.mubr.f32.mxu1 %v2785_v30 }
 0x66b   :  { %2582 = vmatmul.mubr.msk.f32.gmra.mrb[32].mxu1 %vm589_vm2, %v3459_v12 }
 0x6b7   :  { %v2387_v35 = vpop.f32.mrb[26].mxu0 }
 0x6b8   :  { %v2388_v24 = vadd.f32 %v2387_v35, %v3180_v8  ;;  %v2389_v31 = vpop.f32.mrb[27].mxu0 }
 0x6b9   :  { %v2390_v62 = vadd.f32 %v2389_v31, %v3180_v8 }
 0x6ba   :  { %2499 = vst [vmem:[%s3605_s19] sm:$0xff] %v2388_v24 }
 0x6bb   :  { %2500 = vst [vmem:[%s3605_s19 + $0x8] sm:$0xff] %v2390_v62  ;;  %v2393_v52 = vpop.f32.mrb[28].mxu0 }
 0x6bc   :  { %v2394_v30 = vadd.f32 %v2393_v52, %v3174_v6  ;;  %v2395_v56 = vpop.f32.mrb[29].mxu0 }
 0x6bd   :  { %v2396_v12 = vadd.f32 %v2395_v56, %v3174_v6 }
 0x6be   :  { %2503 = vst [vmem:[%s3605_s19 + $0x20] sm:$0xff] %v2394_v30 }
 0x6bf   :  { %2504 = vst [vmem:[%s3605_s19 + $0x28] sm:$0xff] %v2396_v12  ;;  %v2399_v11 = vpop.f32.mrb[30].mxu0 }
 0x6c0   :  { %v2400_v0 = vadd.f32 %v2399_v11, %v3183_v15  ;;  %v2401_v54 = vpop.f32.mrb[31].mxu0 }
 0x6c1   :  { %v2402_v5 = vadd.f32 %v2401_v54, %v3183_v15 }
 0x6c2   :  { %2507 = vst [vmem:[%s3605_s19 + $0x40] sm:$0xff] %v2400_v0 }
 0x6c3   :  { %2508 = vst [vmem:[%s3605_s19 + $0x48] sm:$0xff] %v2402_v5  ;;  %v2405_v3 = vpop.f32.mrb[32].mxu0 }
 0x6c4   :  { %v2406_v1 = vadd.f32 %v2405_v3, %v3178_v63  ;;  %v2407_v47 = vpop.f32.mrb[33].mxu0 }
 0x6c5   :  { %v2408_v43 = vadd.f32 %v2407_v47, %v3178_v63 }
 0x6c6   :  { %2511 = vst [vmem:[%s3605_s19 + $0x60] sm:$0xff] %v2406_v1 }
 0x6c7   :  { %2512 = vst [vmem:[%s3605_s19 + $0x68] sm:$0xff] %v2408_v43 }
 0x732   :  { %v2476_v38 = vpop.f32.mrb[26].mxu1 }
 0x733   :  { %v2477_v7 = vadd.f32 %v2476_v38, %v3180_v8  ;;  %v2478_v50 = vpop.f32.mrb[27].mxu1 }
 0x734   :  { %v2479_v51 = vadd.f32 %v2478_v50, %v3180_v8 }
 0x735   :  { %2501 = vst [vmem:[%s3605_s19 + $0x10] sm:$0xff] %v2477_v7 }
 0x736   :  { %2502 = vst [vmem:[%s3605_s19 + $0x18] sm:$0xff] %v2479_v51  ;;  %v2482_v27 = vpop.f32.mrb[28].mxu1 }
 0x737   :  { %v2483_v39 = vadd.f32 %v2482_v27, %v3174_v6  ;;  %v2484_v18 = vpop.f32.mrb[29].mxu1 }
 0x738   :  { %v2485_v14 = vadd.f32 %v2484_v18, %v3174_v6 }
 0x739   :  { %2505 = vst [vmem:[%s3605_s19 + $0x30] sm:$0xff] %v2483_v39 }
 0x73a   :  { %2506 = vst [vmem:[%s3605_s19 + $0x38] sm:$0xff] %v2485_v14  ;;  %v2488_v8 = vpop.f32.mrb[30].mxu1 }
 0x73b   :  { %v2489_v25 = vadd.f32 %v2488_v8, %v3183_v15  ;;  %v2490_v2 = vpop.f32.mrb[31].mxu1 }
 0x73c   :  { %v2491_v17 = vadd.f32 %v2490_v2, %v3183_v15 }
 0x73d   :  { %2509 = vst [vmem:[%s3605_s19 + $0x50] sm:$0xff] %v2489_v25 }
 0x73e   :  { %2510 = vst [vmem:[%s3605_s19 + $0x58] sm:$0xff] %v2491_v17  ;;  %v2494_v6 = vpop.f32.mrb[32].mxu1 }
 0x73f   :  { %v2495_v55 = vadd.f32 %v2494_v6, %v3178_v63  ;;  %v2496_v49 = vpop.f32.mrb[33].mxu1 }
 0x740   :  { %v2497_v26 = vadd.f32 %v2496_v49, %v3178_v63 }
 0x741   :  { %2513 = vst [vmem:[%s3605_s19 + $0x70] sm:$0xff] %v2495_v55 }
 0x742   :  { %2514 = vst [vmem:[%s3605_s19 + $0x78] sm:$0xff] %v2497_v26 }

</bundles_post_ra>
